<compile_context>
chip_gen: v6e
topology: v6e:2x2x1
jax: 0.10.0
libtpu: 0.0.40
codegen_flags: <defaults>
</compile_context>

<pallas_src>
import functools

import jax
import jax.numpy as jnp
from jax import lax
from jax.experimental import pallas as pl
from jax.experimental.pallas import tpu as pltpu

BN_EPS = 1e-5


# ---------------------------------------------------------------------------
# Shared helpers (traced inside kernels).
# ---------------------------------------------------------------------------
def _bn_scale_shift(sum_row, sumsq_row, gamma, beta, inv_n):
    """Fold batch-global BatchNorm statistics into one scale/shift pair."""
    mean = sum_row * inv_n
    var = jnp.maximum(sumsq_row * inv_n - mean * mean, 0.0)   # clamp cancellation
    inv_std = lax.rsqrt(var + BN_EPS)                         # EUP slot
    scale = gamma * inv_std
    shift = beta - mean * scale
    return scale, shift


def _tile_stats(h, tile_row0, n_rows, needs_mask):
    """[2, in_dim] partial (sum, sum-of-squares); padded rows masked out."""
    if needs_mask:
        rows = lax.broadcasted_iota(jnp.int32, (h.shape[0], 1), 0) + tile_row0
        hm = jnp.where(rows < n_rows, h, 0.0)
    else:
        hm = h
    return jnp.concatenate([jnp.sum(hm, axis=0, keepdims=True),
                            jnp.sum(hm * h, axis=0, keepdims=True)], axis=0)


# ---------------------------------------------------------------------------
# Fused single-kernel path: grid=(2, nt); h lives in VMEM scratch.
# ---------------------------------------------------------------------------
def _fused_kernel(x_ref, w1_ref, b1_ref, gamma_ref, beta_ref, w2_ref, b2_ref,
                  out_ref, h_ref, stats_ref, ss_ref, *, n_rows, tb, needs_mask):
    phase = pl.program_id(0)
    i = pl.program_id(1)

    @pl.when(phase == 0)
    def _encode():
        # h = x @ W1 + b1 ; bf16 cast happens here (in-kernel), f32 MXU accumulate.
        h = jnp.dot(x_ref[...].astype(jnp.bfloat16),
                    w1_ref[...].astype(jnp.bfloat16),
                    preferred_element_type=jnp.float32) + b1_ref[...]
        h_ref[i] = h                                   # stays on-chip (VMEM scratch)

        part = _tile_stats(h, i * tb, n_rows, needs_mask)

        @pl.when(i == 0)
        def _init():
            stats_ref[...] = jnp.zeros_like(stats_ref)

        stats_ref[...] += part                         # batch-global accumulation

    @pl.when(phase == 1)
    def _decode():
        @pl.when(i == 0)
        def _fold_bn():
            s = stats_ref[...]
            scale, shift = _bn_scale_shift(s[0:1, :], s[1:2, :],
                                           gamma_ref[...], beta_ref[...],
                                           1.0 / n_rows)
            ss_ref[...] = jnp.concatenate([scale, shift], axis=0)

        a = jnp.maximum(h_ref[i] * ss_ref[0:1, :] + ss_ref[1:2, :], 0.0)
        y = jnp.dot(a.astype(jnp.bfloat16),
                    w2_ref[...].astype(jnp.bfloat16),
                    preferred_element_type=jnp.float32) + b2_ref[...]
        out_ref[...] = y.astype(out_ref.dtype)


def _forward_fused(x, w1, b1, gamma, beta, w2, b2, *, tb, nt, n_rows, needs_mask,
                   vmem_limit):
    b_pad, input_dim = x.shape
    in_dim = w1.shape[1]
    kernel = functools.partial(_fused_kernel, n_rows=n_rows, tb=tb,
                               needs_mask=needs_mask)
    cost = pl.CostEstimate(
        flops=4 * b_pad * input_dim * in_dim + 10 * b_pad * in_dim,
        transcendentals=in_dim,
        bytes_accessed=4 * (2 * b_pad * input_dim + 2 * input_dim * in_dim
                            + 4 * in_dim + input_dim))
    return pl.pallas_call(
        kernel,
        out_shape=jax.ShapeDtypeStruct((b_pad, input_dim), jnp.float32),
        grid_spec=pltpu.PrefetchScalarGridSpec(
            num_scalar_prefetch=0,
            grid=(2, nt),                               # (phase, batch tile)
            in_specs=[
                # x: tile i in phase 0; pinned to block 0 in phase 1 (unused).
                pl.BlockSpec((tb, input_dim), lambda p, i: (i * (1 - p), 0)),
                pl.BlockSpec((input_dim, in_dim), lambda p, i: (0, 0)),   # W1 resident
                pl.BlockSpec((1, in_dim), lambda p, i: (0, 0)),           # b1
                pl.BlockSpec((1, in_dim), lambda p, i: (0, 0)),           # gamma
                pl.BlockSpec((1, in_dim), lambda p, i: (0, 0)),           # beta
                pl.BlockSpec((in_dim, input_dim), lambda p, i: (0, 0)),   # W2 resident
                pl.BlockSpec((1, input_dim), lambda p, i: (0, 0)),        # b2
            ],
            # Output only produced in phase 1; keep it parked on block 0 during phase 0.
            out_specs=pl.BlockSpec((tb, input_dim), lambda p, i: (i * p, 0)),
            scratch_shapes=[
                pltpu.VMEM((nt, tb, in_dim), jnp.float32),   # h kept on-chip
                pltpu.VMEM((2, in_dim), jnp.float32),        # global sum / sumsq
                pltpu.VMEM((2, in_dim), jnp.float32),        # folded scale / shift
            ]),
        compiler_params=pltpu.CompilerParams(
            # Phase axis is a true dependence; tile axis must stay on one core so the
            # stats / h scratches remain batch-global.
            dimension_semantics=("arbitrary", "arbitrary"),
            vmem_limit_bytes=vmem_limit),
        cost_estimate=cost,
    )(x, w1, b1, gamma, beta, w2, b2)


# ---------------------------------------------------------------------------
# Fallback (large B): two-pass, h recomputed instead of materialized in HBM.
# ---------------------------------------------------------------------------
def _stats_kernel(x_ref, w1_ref, b1_ref, stats_ref, *, n_rows, tb, needs_mask):
    i = pl.program_id(0)
    h = jnp.dot(x_ref[...].astype(jnp.bfloat16),
                w1_ref[...].astype(jnp.bfloat16),
                preferred_element_type=jnp.float32) + b1_ref[...]
    stats_ref[...] = _tile_stats(h, i * tb, n_rows, needs_mask)


def _apply_kernel(pstats_ref, x_ref, w1_ref, b1_ref, gamma_ref, beta_ref,
                  w2_ref, b2_ref, out_ref, *, inv_n):
    # Cross-tile stats reduce happens in-kernel (no standalone XLA reduce).
    s = jnp.sum(pstats_ref[...], axis=0)               # [2, in_dim]
    scale, shift = _bn_scale_shift(s[0:1, :], s[1:2, :],
                                   gamma_ref[...], beta_ref[...], inv_n)
    h = jnp.dot(x_ref[...].astype(jnp.bfloat16),
                w1_ref[...].astype(jnp.bfloat16),
                preferred_element_type=jnp.float32) + b1_ref[...]
    a = jnp.maximum(h * scale + shift, 0.0)
    y = jnp.dot(a.astype(jnp.bfloat16),
                w2_ref[...].astype(jnp.bfloat16),
                preferred_element_type=jnp.float32) + b2_ref[...]
    out_ref[...] = y.astype(out_ref.dtype)


def _forward_two_pass(x, w1, b1, gamma, beta, w2, b2, *, tb, nt, n_rows, needs_mask,
                      vmem_limit):
    b_pad, input_dim = x.shape
    in_dim = w1.shape[1]

    partial_stats = pl.pallas_call(
        functools.partial(_stats_kernel, n_rows=n_rows, tb=tb, needs_mask=needs_mask),
        out_shape=jax.ShapeDtypeStruct((nt, 2, in_dim), jnp.float32),
        grid_spec=pltpu.PrefetchScalarGridSpec(
            num_scalar_prefetch=0, grid=(nt,),
            in_specs=[
                pl.BlockSpec((tb, input_dim), lambda i: (i, 0)),
                pl.BlockSpec((input_dim, in_dim), lambda i: (0, 0)),   # W1 resident
                pl.BlockSpec((1, in_dim), lambda i: (0, 0)),
            ],
            out_specs=pl.BlockSpec((None, 2, in_dim), lambda i: (i, 0, 0))),
        compiler_params=pltpu.CompilerParams(
            dimension_semantics=("parallel",),
            vmem_limit_bytes=vmem_limit),
    )(x, w1, b1)

    return pl.pallas_call(
        functools.partial(_apply_kernel, inv_n=1.0 / n_rows),
        out_shape=jax.ShapeDtypeStruct((b_pad, input_dim), jnp.float32),
        grid_spec=pltpu.PrefetchScalarGridSpec(
            num_scalar_prefetch=0, grid=(nt,),
            in_specs=[
                pl.BlockSpec((nt, 2, in_dim), lambda i: (0, 0, 0)),    # stats resident
                pl.BlockSpec((tb, input_dim), lambda i: (i, 0)),
                pl.BlockSpec((input_dim, in_dim), lambda i: (0, 0)),   # W1 resident
                pl.BlockSpec((1, in_dim), lambda i: (0, 0)),
                pl.BlockSpec((1, in_dim), lambda i: (0, 0)),
                pl.BlockSpec((1, in_dim), lambda i: (0, 0)),
                pl.BlockSpec((in_dim, input_dim), lambda i: (0, 0)),   # W2 resident
                pl.BlockSpec((1, input_dim), lambda i: (0, 0)),
            ],
            out_specs=pl.BlockSpec((tb, input_dim), lambda i: (i, 0))),
        compiler_params=pltpu.CompilerParams(
            dimension_semantics=("parallel",),
            vmem_limit_bytes=vmem_limit),
    )(partial_stats, x, w1, b1, gamma, beta, w2, b2)


# ---------------------------------------------------------------------------
# Public wrapper.
# ---------------------------------------------------------------------------
def autoencoder_forward(x, w1, b1, gamma, beta, w2, b2, *, batch_tile=512,
                        force_two_pass=False):
    """x: [B, INPUT_DIM] f32; w1: [INPUT_DIM, in_dim]; w2: [in_dim, INPUT_DIM];
    b1/gamma/beta: [1, in_dim]; b2: [1, INPUT_DIM].  Returns [B, INPUT_DIM] f32."""
    B, input_dim = x.shape
    in_dim = w1.shape[1]

    # Batch tile (multiple of 8 sublanes); pad the batch rather than one giant tile.
    tb = ((min(batch_tile, B) + 7) // 8) * 8
    tb = max(tb, 8)
    b_pad = ((B + tb - 1) // tb) * tb
    nt = b_pad // tb
    needs_mask = b_pad != B
    if needs_mask:
        x = jnp.pad(x, ((0, b_pad - B), (0, 0)))

    # VMEM budgeting (double-buffered inputs/outputs + persistent scratch).
    resident_bytes = 4 * (input_dim * in_dim + in_dim * input_dim
                          + 3 * in_dim + input_dim)
    tile_bytes = 4 * (tb * input_dim + tb * input_dim)          # x tile + out tile
    scratch_fused = 4 * (nt * tb * in_dim + 4 * in_dim)
    need_fused = 2 * (resident_bytes + tile_bytes) + scratch_fused
    need_two_pass = 2 * (resident_bytes + tile_bytes + 4 * nt * 2 * in_dim)

    def _limit(need):
        return int(min(56 * 1024 * 1024, max(2 * need, 16 * 1024 * 1024)))

    # Fused path only when the whole h (plus weights/tiles) fits comfortably in VMEM
    # (gate sized for v7x's 64 MiB; v5e/v6e have 128 MiB).
    use_fused = (not force_two_pass) and need_fused <= 40 * 1024 * 1024

    if use_fused:
        out = _forward_fused(x, w1, b1, gamma, beta, w2, b2,
                             tb=tb, nt=nt, n_rows=B, needs_mask=needs_mask,
                             vmem_limit=_limit(need_fused))
    else:
        out = _forward_two_pass(x, w1, b1, gamma, beta, w2, b2,
                                tb=tb, nt=nt, n_rows=B, needs_mask=needs_mask,
                                vmem_limit=_limit(need_two_pass))
    return out[:B] if needs_mask else out


def _ref_forward(x, w1, b1, gamma, beta, w2, b2):
    h = x @ w1 + b1
    mean = jnp.mean(h, axis=0, keepdims=True)
    var = jnp.mean((h - mean) ** 2, axis=0, keepdims=True)
    h = (h - mean) / jnp.sqrt(var + BN_EPS)
    h = h * gamma + beta
    h = jnp.maximum(h, 0.0)
    return h @ w2 + b2


if __name__ == "__main__":
    B = 192          # batch
    INPUT_DIM = 256  # input feature dim (lane-dense)
    IN_DIM = 128     # hidden (encoded) dim

    key = jax.random.PRNGKey(0)
    kx, kw1, kb1, kw2, kb2 = jax.random.split(key, 5)

    x = jax.random.normal(kx, (B, INPUT_DIM), dtype=jnp.float32)

    # PyTorch-style uniform init bounds.
    bound1 = 1.0 / (INPUT_DIM ** 0.5)
    w1 = jax.random.uniform(kw1, (INPUT_DIM, IN_DIM), jnp.float32, -bound1, bound1)
    b1 = jax.random.uniform(kb1, (1, IN_DIM), jnp.float32, -bound1, bound1)

    gamma = jnp.ones((1, IN_DIM), jnp.float32)   # BatchNorm1d weight
    beta = jnp.zeros((1, IN_DIM), jnp.float32)   # BatchNorm1d bias

    bound2 = 1.0 / (IN_DIM ** 0.5)
    w2 = jax.random.uniform(kw2, (IN_DIM, INPUT_DIM), jnp.float32, -bound2, bound2)
    b2 = jax.random.uniform(kb2, (1, INPUT_DIM), jnp.float32, -bound2, bound2)

    ref = _ref_forward(x, w1, b1, gamma, beta, w2, b2)

    # 1) Fused single-kernel path, single batch tile (no padding).
    out = jax.block_until_ready(
        autoencoder_forward(x, w1, b1, gamma, beta, w2, b2, batch_tile=512))
    assert out.shape == (B, INPUT_DIM)
    assert jnp.allclose(out, ref, atol=5e-2, rtol=5e-2)

    # 2) Fused path with multiple batch tiles + batch padding (exercises the stat mask).
    out_tiled = jax.block_until_ready(
        autoencoder_forward(x, w1, b1, gamma, beta, w2, b2, batch_tile=128))
    assert jnp.allclose(out_tiled, ref, atol=5e-2, rtol=5e-2)

    # 3) Two-pass recompute-h fallback (the path taken when h does not fit VMEM).
    out_2p = jax.block_until_ready(
        autoencoder_forward(x, w1, b1, gamma, beta, w2, b2, batch_tile=64,
                            force_two_pass=True))
    assert jnp.allclose(out_2p, ref, atol=5e-2, rtol=5e-2)

    print("KERNEL_OK")
</pallas_src>

<mosaic_0001>
module attributes {stable_mosaic.version = 11 : i64} {
  func.func @_fused_kernel(%arg0: i32, %arg1: i32, %arg2: memref<192x256xf32, #tpu.memory_space<vmem>>, %arg3: memref<256x128xf32, #tpu.memory_space<vmem>>, %arg4: memref<1x128xf32, #tpu.memory_space<vmem>>, %arg5: memref<1x128xf32, #tpu.memory_space<vmem>>, %arg6: memref<1x128xf32, #tpu.memory_space<vmem>>, %arg7: memref<128x256xf32, #tpu.memory_space<vmem>>, %arg8: memref<1x256xf32, #tpu.memory_space<vmem>>, %arg9: memref<192x256xf32, #tpu.memory_space<vmem>>, %arg10: memref<1x192x128xf32, #tpu.memory_space<vmem>>, %arg11: memref<2x128xf32, #tpu.memory_space<vmem>>, %arg12: memref<2x128xf32, #tpu.memory_space<vmem>>) attributes {dimension_semantics = [#tpu.dimension_semantics<arbitrary>, #tpu.dimension_semantics<arbitrary>], iteration_bounds = array<i64: 2, 1>, scalar_prefetch = 0 : i64, scratch_operands = 3 : i64, tpu.core_type = #tpu.core_type<tc>, window_params = [{transform_indices = @transform_0, window_bounds = array<i64: 192, 256>}, {pipeline_mode = #tpu.pipeline_mode<synchronous>, transform_indices = @transform_1, window_bounds = array<i64: 256, 128>}, {pipeline_mode = #tpu.pipeline_mode<synchronous>, transform_indices = @transform_2, window_bounds = array<i64: 1, 128>}, {pipeline_mode = #tpu.pipeline_mode<synchronous>, transform_indices = @transform_3, window_bounds = array<i64: 1, 128>}, {pipeline_mode = #tpu.pipeline_mode<synchronous>, transform_indices = @transform_4, window_bounds = array<i64: 1, 128>}, {pipeline_mode = #tpu.pipeline_mode<synchronous>, transform_indices = @transform_5, window_bounds = array<i64: 128, 256>}, {pipeline_mode = #tpu.pipeline_mode<synchronous>, transform_indices = @transform_6, window_bounds = array<i64: 1, 256>}, {transform_indices = @transform_7, window_bounds = array<i64: 192, 256>}]} {
    %c0_i32 = arith.constant 0 : i32
    %0 = arith.cmpi eq, %arg0, %c0_i32 : i32
    %1 = arith.extui %0 : i1 to i32
    %c0_i32_0 = arith.constant 0 : i32
    %2 = arith.cmpi ne, %1, %c0_i32_0 : i32
    scf.if %2 {
      %c0 = arith.constant 0 : index
      %c0_2 = arith.constant 0 : index
      %6 = vector.load %arg2[%c0, %c0_2] : memref<192x256xf32, #tpu.memory_space<vmem>>, vector<192x256xf32>
      %7 = arith.truncf %6 : vector<192x256xf32> to vector<192x256xbf16>
      %c0_3 = arith.constant 0 : index
      %c0_4 = arith.constant 0 : index
      %8 = vector.load %arg3[%c0_3, %c0_4] : memref<256x128xf32, #tpu.memory_space<vmem>>, vector<256x128xf32>
      %9 = arith.truncf %8 : vector<256x128xf32> to vector<256x128xbf16>
      %cst = arith.constant dense<0.000000e+00> : vector<192x128xf32>
      %10 = tpu.matmul %7, %9, %cst {dimension_numbers = #tpu.dot_dimension_numbers<[1], [0], [0], [1], [0, 0, 1, 1], [], []>} : vector<192x256xbf16>, vector<256x128xbf16>, vector<192x128xf32> -> vector<192x128xf32>
      %c0_5 = arith.constant 0 : index
      %c0_6 = arith.constant 0 : index
      %11 = vector.load %arg4[%c0_5, %c0_6] : memref<1x128xf32, #tpu.memory_space<vmem>>, vector<1x128xf32>
      %12 = vector.broadcast %11 : vector<1x128xf32> to vector<192x128xf32>
      %13 = arith.addf %10, %12 : vector<192x128xf32>
      %14 = arith.index_cast %arg1 : i32 to index
      %c0_7 = arith.constant 0 : index
      %c0_8 = arith.constant 0 : index
      %15 = vector.load %arg10[%14, %c0_7, %c0_8] : memref<1x192x128xf32, #tpu.memory_space<vmem>>, vector<1x192x128xf32>
      %16 = vector.shape_cast %15 : vector<1x192x128xf32> to vector<192x128xf32>
      %17 = vector.shape_cast %13 : vector<192x128xf32> to vector<1x192x128xf32>
      tpu.vector_store %arg10[%14, %c0_7, %c0_8], %17 {strides = array<i32>} : memref<1x192x128xf32, #tpu.memory_space<vmem>>, vector<1x192x128xf32>,
      %cst_9 = arith.constant dense<0.000000e+00> : vector<128xf32>
      %18 = vector.multi_reduction <add>, %13, %cst_9 [0] : vector<192x128xf32> to vector<128xf32>
      %19 = vector.shape_cast %18 : vector<128xf32> to vector<1x128xf32>
      %20 = arith.mulf %13, %13 : vector<192x128xf32>
      %cst_10 = arith.constant dense<0.000000e+00> : vector<128xf32>
      %21 = vector.multi_reduction <add>, %20, %cst_10 [0] : vector<192x128xf32> to vector<128xf32>
      %22 = vector.shape_cast %21 : vector<128xf32> to vector<1x128xf32>
      %23 = tpu.concatenate %19, %22 in 0 : vector<1x128xf32>, vector<1x128xf32> -> vector<2x128xf32>
      %c0_i32_11 = arith.constant 0 : i32
      %24 = arith.cmpi eq, %arg1, %c0_i32_11 : i32
      %25 = arith.extui %24 : i1 to i32
      %c0_i32_12 = arith.constant 0 : i32
      %26 = arith.cmpi ne, %25, %c0_i32_12 : i32
      scf.if %26 {
        %cst_17 = arith.constant 0.000000e+00 : f32
        %30 = vector.broadcast %cst_17 : f32 to vector<2x128xf32>
        %c0_18 = arith.constant 0 : index
        %c0_19 = arith.constant 0 : index
        %31 = vector.load %arg11[%c0_18, %c0_19] : memref<2x128xf32, #tpu.memory_space<vmem>>, vector<2x128xf32>
        tpu.vector_store %arg11[%c0_18, %c0_19], %30 {strides = array<i32>} : memref<2x128xf32, #tpu.memory_space<vmem>>, vector<2x128xf32>,
      } else {
      }
      %c0_13 = arith.constant 0 : index
      %c0_14 = arith.constant 0 : index
      %27 = vector.load %arg11[%c0_13, %c0_14] : memref<2x128xf32, #tpu.memory_space<vmem>>, vector<2x128xf32>
      %28 = arith.addf %27, %23 : vector<2x128xf32>
      %c0_15 = arith.constant 0 : index
      %c0_16 = arith.constant 0 : index
      %29 = vector.load %arg11[%c0_15, %c0_16] : memref<2x128xf32, #tpu.memory_space<vmem>>, vector<2x128xf32>
      tpu.vector_store %arg11[%c0_15, %c0_16], %28 {strides = array<i32>} : memref<2x128xf32, #tpu.memory_space<vmem>>, vector<2x128xf32>,
    } else {
    }
    %c1_i32 = arith.constant 1 : i32
    %3 = arith.cmpi eq, %arg0, %c1_i32 : i32
    %4 = arith.extui %3 : i1 to i32
    %c0_i32_1 = arith.constant 0 : i32
    %5 = arith.cmpi ne, %4, %c0_i32_1 : i32
    scf.if %5 {
      %c0_i32_2 = arith.constant 0 : i32
      %6 = arith.cmpi eq, %arg1, %c0_i32_2 : i32
      %7 = arith.extui %6 : i1 to i32
      %c0_i32_3 = arith.constant 0 : i32
      %8 = arith.cmpi ne, %7, %c0_i32_3 : i32
      scf.if %8 {
        %c0_15 = arith.constant 0 : index
        %c0_16 = arith.constant 0 : index
        %28 = vector.load %arg11[%c0_15, %c0_16] : memref<2x128xf32, #tpu.memory_space<vmem>>, vector<2x128xf32>
        %29 = vector.extract_strided_slice %28 {offsets = [0, 0], sizes = [1, 128], strides = [1, 1]} : vector<2x128xf32> to vector<1x128xf32>
        %30 = vector.extract_strided_slice %28 {offsets = [1, 0], sizes = [1, 128], strides = [1, 1]} : vector<2x128xf32> to vector<1x128xf32>
        %c0_17 = arith.constant 0 : index
        %c0_18 = arith.constant 0 : index
        %31 = vector.load %arg5[%c0_17, %c0_18] : memref<1x128xf32, #tpu.memory_space<vmem>>, vector<1x128xf32>
        %c0_19 = arith.constant 0 : index
        %c0_20 = arith.constant 0 : index
        %32 = vector.load %arg6[%c0_19, %c0_20] : memref<1x128xf32, #tpu.memory_space<vmem>>, vector<1x128xf32>
        %cst_21 = arith.constant 0.00520833349 : f32
        %33 = vector.broadcast %cst_21 : f32 to vector<1x128xf32>
        %34 = arith.mulf %29, %33 : vector<1x128xf32>
        %cst_22 = arith.constant 0.00520833349 : f32
        %35 = vector.broadcast %cst_22 : f32 to vector<1x128xf32>
        %36 = arith.mulf %30, %35 : vector<1x128xf32>
        %37 = arith.mulf %34, %34 : vector<1x128xf32>
        %38 = arith.subf %36, %37 : vector<1x128xf32>
        %cst_23 = arith.constant 0.000000e+00 : f32
        %39 = vector.broadcast %cst_23 : f32 to vector<1x128xf32>
        %40 = arith.maximumf %38, %39 : vector<1x128xf32>
        %cst_24 = arith.constant 9.99999974E-6 : f32
        %41 = vector.broadcast %cst_24 : f32 to vector<1x128xf32>
        %42 = arith.addf %40, %41 : vector<1x128xf32>
        %43 = math.rsqrt %42 : vector<1x128xf32>
        %44 = arith.mulf %31, %43 : vector<1x128xf32>
        %45 = arith.mulf %34, %44 : vector<1x128xf32>
        %46 = arith.subf %32, %45 : vector<1x128xf32>
        %47 = tpu.concatenate %44, %46 in 0 : vector<1x128xf32>, vector<1x128xf32> -> vector<2x128xf32>
        %c0_25 = arith.constant 0 : index
        %c0_26 = arith.constant 0 : index
        %48 = vector.load %arg12[%c0_25, %c0_26] : memref<2x128xf32, #tpu.memory_space<vmem>>, vector<2x128xf32>
        tpu.vector_store %arg12[%c0_25, %c0_26], %47 {strides = array<i32>} : memref<2x128xf32, #tpu.memory_space<vmem>>, vector<2x128xf32>,
      } else {
      }
      %9 = arith.index_cast %arg1 : i32 to index
      %c0 = arith.constant 0 : index
      %c0_4 = arith.constant 0 : index
      %10 = vector.load %arg10[%9, %c0, %c0_4] : memref<1x192x128xf32, #tpu.memory_space<vmem>>, vector<1x192x128xf32>
      %11 = vector.shape_cast %10 : vector<1x192x128xf32> to vector<192x128xf32>
      %c0_5 = arith.constant 0 : index
      %c0_6 = arith.constant 0 : index
      %12 = vector.load %arg12[%c0_5, %c0_6] : memref<2x128xf32, #tpu.memory_space<vmem>>, vector<1x128xf32>
      %13 = vector.broadcast %12 : vector<1x128xf32> to vector<192x128xf32>
      %14 = arith.mulf %11, %13 : vector<192x128xf32>
      %c1 = arith.constant 1 : index
      %c0_7 = arith.constant 0 : index
      %15 = vector.load %arg12[%c1, %c0_7] : memref<2x128xf32, #tpu.memory_space<vmem>>, vector<1x128xf32>
      %16 = vector.broadcast %15 : vector<1x128xf32> to vector<192x128xf32>
      %17 = arith.addf %14, %16 : vector<192x128xf32>
      %cst = arith.constant 0.000000e+00 : f32
      %18 = vector.broadcast %cst : f32 to vector<192x128xf32>
      %19 = arith.maximumf %17, %18 : vector<192x128xf32>
      %20 = arith.truncf %19 : vector<192x128xf32> to vector<192x128xbf16>
      %c0_8 = arith.constant 0 : index
      %c0_9 = arith.constant 0 : index
      %21 = vector.load %arg7[%c0_8, %c0_9] : memref<128x256xf32, #tpu.memory_space<vmem>>, vector<128x256xf32>
      %22 = arith.truncf %21 : vector<128x256xf32> to vector<128x256xbf16>
      %cst_10 = arith.constant dense<0.000000e+00> : vector<192x256xf32>
      %23 = tpu.matmul %20, %22, %cst_10 {dimension_numbers = #tpu.dot_dimension_numbers<[1], [0], [0], [1], [0, 0, 1, 1], [], []>} : vector<192x128xbf16>, vector<128x256xbf16>, vector<192x256xf32> -> vector<192x256xf32>
      %c0_11 = arith.constant 0 : index
      %c0_12 = arith.constant 0 : index
      %24 = vector.load %arg8[%c0_11, %c0_12] : memref<1x256xf32, #tpu.memory_space<vmem>>, vector<1x256xf32>
      %25 = vector.broadcast %24 : vector<1x256xf32> to vector<192x256xf32>
      %26 = arith.addf %23, %25 : vector<192x256xf32>
      %c0_13 = arith.constant 0 : index
      %c0_14 = arith.constant 0 : index
      %27 = vector.load %arg9[%c0_13, %c0_14] : memref<192x256xf32, #tpu.memory_space<vmem>>, vector<192x256xf32>
      tpu.vector_store %arg9[%c0_13, %c0_14], %26 {strides = array<i32>} : memref<192x256xf32, #tpu.memory_space<vmem>>, vector<192x256xf32>,
    } else {
    }
    return
  }
  func.func @transform_0(%arg0: i32, %arg1: i32) -> (i32, i32) {
    %c1_i32 = arith.constant 1 : i32
    %0 = arith.subi %c1_i32, %arg0 : i32
    %1 = arith.muli %arg1, %0 : i32
    %c0_i32 = arith.constant 0 : i32
    %c0_i32_0 = arith.constant 0 : i32
    return %1, %c0_i32 : i32, i32
  }
  func.func @transform_1(%arg0: i32, %arg1: i32) -> (i32, i32) {
    %c0_i32 = arith.constant 0 : i32
    %c0_i32_0 = arith.constant 0 : i32
    %c0_i32_1 = arith.constant 0 : i32
    return %c0_i32, %c0_i32_0 : i32, i32
  }
  func.func @transform_2(%arg0: i32, %arg1: i32) -> (i32, i32) {
    %c0_i32 = arith.constant 0 : i32
    %c0_i32_0 = arith.constant 0 : i32
    %c0_i32_1 = arith.constant 0 : i32
    return %c0_i32, %c0_i32_0 : i32, i32
  }
  func.func @transform_3(%arg0: i32, %arg1: i32) -> (i32, i32) {
    %c0_i32 = arith.constant 0 : i32
    %c0_i32_0 = arith.constant 0 : i32
    %c0_i32_1 = arith.constant 0 : i32
    return %c0_i32, %c0_i32_0 : i32, i32
  }
  func.func @transform_4(%arg0: i32, %arg1: i32) -> (i32, i32) {
    %c0_i32 = arith.constant 0 : i32
    %c0_i32_0 = arith.constant 0 : i32
    %c0_i32_1 = arith.constant 0 : i32
    return %c0_i32, %c0_i32_0 : i32, i32
  }
  func.func @transform_5(%arg0: i32, %arg1: i32) -> (i32, i32) {
    %c0_i32 = arith.constant 0 : i32
    %c0_i32_0 = arith.constant 0 : i32
    %c0_i32_1 = arith.constant 0 : i32
    return %c0_i32, %c0_i32_0 : i32, i32
  }
  func.func @transform_6(%arg0: i32, %arg1: i32) -> (i32, i32) {
    %c0_i32 = arith.constant 0 : i32
    %c0_i32_0 = arith.constant 0 : i32
    %c0_i32_1 = arith.constant 0 : i32
    return %c0_i32, %c0_i32_0 : i32, i32
  }
  func.func @transform_7(%arg0: i32, %arg1: i32) -> (i32, i32) {
    %0 = arith.muli %arg1, %arg0 : i32
    %c0_i32 = arith.constant 0 : i32
    %c0_i32_0 = arith.constant 0 : i32
    return %0, %c0_i32 : i32, i32
  }
}

</mosaic_0001>

<bundles_post_ra>
// kernel: tpu_custom_call.1
= control target key start
LH: loop header
LB: loop body
LE: loop exit
PB: predicated region body
PF: predicated region fallthrough
CT: control target
= control target key end

     0   :  { %12 = vsyncpa [#allocation6], 0  ;;  %s2029_s0 = inlined_call_operand.hbm [shape: f32[192,256], index: 0, kind: input, shape index: {}]   ;;  %s2030_s1 = inlined_call_operand.hbm [shape: f32[256,128], index: 1, kind: input, shape index: {}]   ;;  %s2031_s2 = inlined_call_operand.vmem [shape: f32[1,128], index: 2, kind: input, shape index: {}]   ;;  %s2032_s3 = inlined_call_operand.vmem [shape: f32[1,128], index: 3, kind: input, shape index: {}]   ;;  %s2033_s4 = inlined_call_operand.vmem [shape: f32[1,128], index: 4, kind: input, shape index: {}]   ;;  %s2034_s5 = inlined_call_operand.hbm [shape: f32[128,256], index: 5, kind: input, shape index: {}]   ;;  %s2035_s6 = inlined_call_operand.vmem [shape: f32[1,256], index: 6, kind: input, shape index: {}]   ;;  %s2036_s7 = inlined_call_operand.hbm [shape: f32[192,256], index: 7, kind: output, shape index: {}]  }
   0x1   :  { %14 = vsyncpa [#allocation6 + $0x1], 0 }
   0x2   :  { %15 = vsyncpa [#allocation9], 0 }
   0x3   :  { %16 = vsyncpa [#allocation7], 0 }
   0x4   :  { %18 = vsyncpa [#allocation7 + $0x1], 0  ;;  %s1692_s24 = smov 0   ;;  %s1694_s25 = smov 0  }
   0x5   :  { %s1696_s26 = smov 0  }
   0x6 LB: > { %s1281_s27 = sadd.s32 4294967295, %s1637_s26   ;;  %s1282_s28 = sadd.s32 4294967294, %s1637_s26   ;;  %s1637_s26 = sphi %s1696_s26, %s24_s26   ;;  %s1633_s25 = sphi %s1694_s25, %s2043_s25   ;;  %s1629_s24 = sphi %s1692_s24, %s2042_s24  }
   0x7   : > { %s36_s29 = sadd.s32 1, %s1633_s25  ;;  %p1283_p0 = scmp.ge.s32.totalorder %s1637_s26, 1 }
   0x8   : > { %p38_p1 = scmp.ge.s32.totalorder %s36_s29, 2  ;;  %p225_p2 = scmp.lt.s32.totalorder %s1637_s26, 3 }
   0x9   : > { %p1714_p3 = scmp.eq.s32.totalorder %s1281_s27, 0  ;;  %s1639_s9 = smov [#allocation8]  }
   0xa   : > { %s2045_s29 = smov (%p38_p1, %s36_s29), 0  ;;  %p1720_p4 = pnand %p1283_p0, %p225_p2 }
   0xb   : > { %s237_s10 = sshll.u32 %s1639_s9, 4  ;;  %s1640_s12 = smov [#allocation10]   ;;  %s238_s10 = int_to_ptr.vmem [resolvable:$true] %s237_s10 }
   0xc   : > { %p1437_p5 = pneg %p1720_p4  ;;  %s259_s13 = sshll.u32 %s1640_s12, 4  ;;  %s260_s13 = int_to_ptr.vmem [resolvable:$true] %s259_s13 }
   0xd   : > { %s1512_s14 = scalar_lea.vmem %s238_s10, 4096  ;;  %p1520_p12 = scmp.lt.s32.totalorder %s238_s10, %s238_s10 }
   0xe   : > { %p1729_p7 = pnand %p1714_p3, %p1437_p5  ;;  %p1513_p9 = scmp.ne.s32.totalorder %s238_s10, %s1512_s14 }
   0xf   : > { %p1521_p13 = scmp.lt.s32.totalorder %s1512_s14, %s1512_s14 }
  0x10   : > { %p1503_p8 = pneg %p1729_p7 }
  0x11   : > { %p1522_p0 = por %p1521_p13, %p1520_p12 }
  0x12   : > { %p1515_p10 = pnand %p1513_p9, %p1503_p8 }
  0x14   : > { %p1516_p11 = pneg %p1515_p10 }
  0x16   : > { %p1523_p1 = pnand %p1522_p0, %p1516_p11 }
  0x18   : > { %1526 = shalt.err (!%p1523_p1)
}
  0x19   : > { %s1641_s15 = smov 128   ;;  %s1642_s16 = smov 8  }
  0x1a   : > { %1440 = dma.hbm_to_vmem [thread:$0]  (!%p1729_p7), %s2030_s1, 4096, %s238_s10, [#allocation9], %s1641_s15, %s1641_s15, %s1642_s16  }
  0x1b   : > { %s1538_s19 = scalar_lea.vmem %s260_s13, 4096  ;;  %p1546_p10 = scmp.lt.s32.totalorder %s260_s13, %s260_s13 }
  0x1c   : > { %p1539_p2 = scmp.ne.s32.totalorder %s260_s13, %s1538_s19  ;;  %p1547_p12 = scmp.lt.s32.totalorder %s1538_s19, %s1538_s19 }
  0x1e   : > { %p1541_p5 = pnand %p1539_p2, %p1503_p8  ;;  %p1548_p11 = por %p1547_p12, %p1546_p10 }
  0x20   : > { %p1542_p9 = pneg %p1541_p5 }
  0x22   : > { %p1549_p13 = pnand %p1548_p11, %p1542_p9 }
  0x24   : > { %1552 = shalt.err (!%p1549_p13)
}
  0x25   : > { %s1643_s20 = smov 256   ;;  %s1644_s21 = smov 16  }
  0x26   : > { %1443 = dma.hbm_to_vmem [thread:$0]  (!%p1729_p7), %s2034_s5, 4096, %s260_s13, [#allocation9], %s1643_s20, %s1643_s20, %s1644_s21  }
  0x27   : > { %p1454_p0 = scmp.lt.s32.totalorder %s1637_s26, 2  ;;  %p1455_p1 = scmp.eq.s32.totalorder %s1637_s26, 0 }
  0x28   : > { %s1645_s9 = smov [#allocation5]  }
  0x29   : > { %s290_s10 = sshll.u32 %s1645_s9, 4  ;;  %p1445_p8 = pnand %p1455_p1, %p1454_p0  ;;  %s291_s10 = int_to_ptr.vmem [resolvable:$true] %s290_s10 }
  0x2a   : > { %s1564_s12 = scalar_lea.vmem %s291_s10, 6144  ;;  %s1571_s14 = scalar_lea.vmem %s291_s10, 12288 }
  0x2b   : > { %p1555_p2 = pneg %p1445_p8  ;;  %p1565_p5 = scmp.ne.s32.totalorder %s291_s10, %s1564_s12 }
  0x2c   : > { %p1572_p12 = scmp.lt.s32.totalorder %s291_s10, %s291_s10  ;;  %p1573_p11 = scmp.lt.s32.totalorder %s1571_s14, %s1564_s12 }
  0x2d   : > { %p1567_p9 = pnand %p1565_p5, %p1555_p2 }
  0x2e   : > { %p1574_p13 = por %p1573_p11, %p1572_p12 }
  0x2f   : > { %p1568_p10 = pneg %p1567_p9 }
  0x31   : > { %p1575_p6 = pnand %p1574_p13, %p1568_p10 }
  0x33   : > { %1578 = shalt.err (!%p1575_p6)
}
  0x34   : > { %1447 = dma.hbm_to_vmem [thread:$0]  (!%p1445_p8), %s2029_s0, 6144, %s291_s10, [#allocation6], %s1643_s20, %s1643_s20, %s1644_s21  }
  0x35   : > { %302 = sbr.rel (%p1720_p4) target bundleno = 717 (0x2cd), region = 48 }
  0x3a   : > { %1616 = dma.done.wait (%p1714_p3), [#allocation6], 6144  }
  0x3b   : > { %1618 = vsyncadd (%p1714_p3), [#allocation6], 4294961152 }
  0x3c   : > { %1620 = dma.done.wait (%p1714_p3), [#allocation9], 8192  }
  0x3d   : > { %1622 = vsyncadd (%p1714_p3), [#allocation9], 4294959104  ;;  %p1292_p6 = scmp.ne.s32.totalorder %s1629_s24, 0 }
  0x3f   : > { %356 = sbr.rel (%p1292_p6) target bundleno = 390 (0x186), region = 64 }
  0x44   : > { %v459_v0 = vld [vmem:[#allocation8 + $0xf0] sm:$0xff]  ;;  %v460_v1 = vld [vmem:[#allocation8 + $0xf8] sm:$0xff]  ;;  %v457_v5 = vld [vmem:[#allocation8 + $0xe0] sm:$0xff]  ;;  %vm721_vm0 = vcmask 1040384  }
  0x45   : > { %v443_v2 = vld [vmem:[#allocation8 + $0x70] sm:$0xff]  ;;  %v476_v3 = vpack.c.bf16 %v460_v1, %v459_v0  ;;  %v444_v4 = vld [vmem:[#allocation8 + $0x78] sm:$0xff]  ;;  %v458_v6 = vld [vmem:[#allocation8 + $0xe8] sm:$0xff] }
  0x46   : > { %v468_v7 = vpack.c.bf16 %v444_v4, %v443_v2  ;;  %v475_v8 = vpack.c.bf16 %v458_v6, %v457_v5  ;;  %v441_v9 = vld [vmem:[#allocation8 + $0x60] sm:$0xff]  ;;  %v442_v10 = vld [vmem:[#allocation8 + $0x68] sm:$0xff]  ;;  %v455_v11 = vld [vmem:[#allocation8 + $0xd0] sm:$0xff] }
  0x47   : > { %1301 = vmatprep.subr.bf16.mxu0 %v476_v3  ;;  %v456_v12 = vld [vmem:[#allocation8 + $0xd8] sm:$0xff]  ;;  %1389 = vmatprep.subr.bf16.mxu1 %v476_v3  ;;  %v467_v13 = vpack.c.bf16 %v442_v10, %v441_v9  ;;  %v439_v15 = vld [vmem:[#allocation8 + $0x50] sm:$0xff]  ;;  %v453_v17 = vld [vmem:[#allocation8 + $0xc0] sm:$0xff] }
  0x48   : > { %1302 = vmatpush3.bf16.msra.mxu0 %v468_v7  ;;  %1397 = vmatpush3.bf16.msra.mxu1 %v468_v7  ;;  %v474_v14 = vpack.c.bf16 %v456_v12, %v455_v11  ;;  %v440_v16 = vld [vmem:[#allocation8 + $0x58] sm:$0xff]  ;;  %v454_v18 = vld [vmem:[#allocation8 + $0xc8] sm:$0xff]  ;;  %v437_v21 = vld [vmem:[#allocation8 + $0x40] sm:$0xff] }
  0x49   : > { %1303 = vmatprep.subr.bf16.mxu0 %v475_v8  ;;  %1390 = vmatprep.subr.bf16.mxu1 %v475_v8  ;;  %v466_v19 = vpack.c.bf16 %v440_v16, %v439_v15  ;;  %v473_v20 = vpack.c.bf16 %v454_v18, %v453_v17  ;;  %v438_v22 = vld [vmem:[#allocation8 + $0x48] sm:$0xff]  ;;  %v451_v23 = vld [vmem:[#allocation8 + $0xb0] sm:$0xff]  ;;  %v452_v24 = vld [vmem:[#allocation8 + $0xb8] sm:$0xff] }
  0x4a   : > { %v358_v25 = vld [vmem:[#allocation5 + $0x8] sm:$0xff]  ;;  %v360_v26 = vld [vmem:[#allocation5 + $0x18] sm:$0xff]  ;;  %v465_v27 = vpack.c.bf16 %v438_v22, %v437_v21  ;;  %v472_v29 = vpack.c.bf16 %v452_v24, %v451_v23  ;;  %v435_v30 = vld [vmem:[#allocation8 + $0x30] sm:$0xff] }
  0x4b   : > { %v406_v28 = vpack.c.bf16 %v360_v26, %v358_v25  ;;  %v436_v31 = vld [vmem:[#allocation8 + $0x38] sm:$0xff]  ;;  %v449_v32 = vld [vmem:[#allocation8 + $0xa0] sm:$0xff]  ;;  %v450_v33 = vld [vmem:[#allocation8 + $0xa8] sm:$0xff] }
  0x4c   : > { %1304 = vmatpush3.bf16.msra.mxu0 %v467_v13  ;;  %1398 = vmatpush3.bf16.msra.mxu1 %v467_v13  ;;  %v382_v34 = vld [vmem:[#allocation5 + $0xc8] sm:$0xff]  ;;  %v384_v35 = vld [vmem:[#allocation5 + $0xd8] sm:$0xff]  ;;  %v464_v36 = vpack.c.bf16 %v436_v31, %v435_v30  ;;  %v471_v38 = vpack.c.bf16 %v450_v33, %v449_v32  ;;  %v433_v39 = vld [vmem:[#allocation8 + $0x20] sm:$0xff] }
  0x4d   : > { %1305 = vmatprep.subr.bf16.mxu0 %v474_v14  ;;  %1391 = vmatprep.subr.bf16.mxu1 %v474_v14  ;;  %v418_v37 = vpack.c.bf16 %v384_v35, %v382_v34  ;;  %v434_v40 = vld [vmem:[#allocation8 + $0x28] sm:$0xff]  ;;  %v447_v41 = vld [vmem:[#allocation8 + $0x90] sm:$0xff]  ;;  %v448_v42 = vld [vmem:[#allocation8 + $0x98] sm:$0xff] }
  0x4e   : > { %516 = vmatprep.mubr.bf16.mxu0 %v406_v28  ;;  %v463_v43 = vpack.c.bf16 %v434_v40, %v433_v39  ;;  %v470_v44 = vpack.c.bf16 %v448_v42, %v447_v41  ;;  %v431_v45 = vld [vmem:[#allocation8 + $0x10] sm:$0xff]  ;;  %v432_v46 = vld [vmem:[#allocation8 + $0x18] sm:$0xff]  ;;  %v445_v47 = vld [vmem:[#allocation8 + $0x80] sm:$0xff] }
  0x4f   : > { %564 = vmatprep.mubr.bf16.mxu1 %v418_v37  ;;  %v446_v48 = vld [vmem:[#allocation8 + $0x88] sm:$0xff]  ;;  %v462_v49 = vpack.c.bf16 %v432_v46, %v431_v45  ;;  %v429_v51 = vld [vmem:[#allocation8] sm:$0xff]  ;;  %v359_v54 = vld [vmem:[#allocation5 + $0x10] sm:$0xff] }
  0x50   : > { %1306 = vmatpush3.bf16.msra.mxu0 %v466_v19  ;;  %1399 = vmatpush3.bf16.msra.mxu1 %v466_v19  ;;  %v469_v50 = vpack.c.bf16 %v446_v48, %v445_v47  ;;  %v430_v52 = vld [vmem:[#allocation8 + $0x8] sm:$0xff]  ;;  %v357_v53 = vld [vmem:[#allocation5] sm:$0xff]  ;;  %v383_v58 = vld [vmem:[#allocation5 + $0xd0] sm:$0xff] }
  0x51   : > { %1307 = vmatprep.subr.bf16.mxu0 %v473_v20  ;;  %1392 = vmatprep.subr.bf16.mxu1 %v473_v20  ;;  %v461_v55 = vpack.c.bf16 %v430_v52, %v429_v51  ;;  %v362_v56 = vld [vmem:[#allocation5 + $0x28] sm:$0xff]  ;;  %v381_v57 = vld [vmem:[#allocation5 + $0xc0] sm:$0xff]  ;;  %v364_v59 = vld [vmem:[#allocation5 + $0x38] sm:$0xff]  ;;  %v405_v62 = vpack.c.bf16 %v359_v54, %v357_v53 }
  0x52   : > { %v386_v60 = vld [vmem:[#allocation5 + $0xe8] sm:$0xff]  ;;  %v388_v61 = vld [vmem:[#allocation5 + $0xf8] sm:$0xff]  ;;  %v417_v63 = vpack.c.bf16 %v383_v58, %v381_v57  ;;  %v408_v0 = vpack.c.bf16 %v364_v59, %v362_v56  ;;  %v361_v2 = vld [vmem:[#allocation5 + $0x20] sm:$0xff]  ;;  %v1646_v56 = vmov 0.0  }
  0x53   : > { %v420_v1 = vpack.c.bf16 %v388_v61, %v386_v60  ;;  %v363_v3 = vld [vmem:[#allocation5 + $0x30] sm:$0xff]  ;;  %v366_v4 = vld [vmem:[#allocation5 + $0x48] sm:$0xff]  ;;  %v385_v5 = vld [vmem:[#allocation5 + $0xe0] sm:$0xff]  ;;  %727 = vst [vmem:[#allocation3] sm:$0x3] %v1646_v56 }
  0x54   : > { %1308 = vmatpush3.bf16.msra.mxu0 %v465_v27  ;;  %1400 = vmatpush3.bf16.msra.mxu1 %v465_v27  ;;  %v387_v6 = vld [vmem:[#allocation5 + $0xf0] sm:$0xff]  ;;  %v368_v7 = vld [vmem:[#allocation5 + $0x58] sm:$0xff]  ;;  %v390_v8 = vld [vmem:[#allocation5 + $0x108] sm:$0xff]  ;;  %v407_v10 = vpack.c.bf16 %v363_v3, %v361_v2 }
  0x55   : > { %1309 = vmatprep.subr.bf16.mxu0 %v472_v29  ;;  %1393 = vmatprep.subr.bf16.mxu1 %v472_v29  ;;  %v392_v9 = vld [vmem:[#allocation5 + $0x118] sm:$0xff]  ;;  %v419_v11 = vpack.c.bf16 %v387_v6, %v385_v5  ;;  %v410_v12 = vpack.c.bf16 %v368_v7, %v366_v4  ;;  %v365_v14 = vld [vmem:[#allocation5 + $0x40] sm:$0xff]  ;;  %v367_v15 = vld [vmem:[#allocation5 + $0x50] sm:$0xff] }
  0x56   : > { %v422_v13 = vpack.c.bf16 %v392_v9, %v390_v8  ;;  %v370_v16 = vld [vmem:[#allocation5 + $0x68] sm:$0xff]  ;;  %v389_v17 = vld [vmem:[#allocation5 + $0x100] sm:$0xff]  ;;  %v391_v18 = vld [vmem:[#allocation5 + $0x110] sm:$0xff]  ;;  %v409_v22 = vpack.c.bf16 %v367_v15, %v365_v14 }
  0x57   : > { %v372_v19 = vld [vmem:[#allocation5 + $0x78] sm:$0xff]  ;;  %v394_v20 = vld [vmem:[#allocation5 + $0x128] sm:$0xff]  ;;  %v421_v23 = vpack.c.bf16 %v391_v18, %v389_v17  ;;  %v369_v26 = vld [vmem:[#allocation5 + $0x60] sm:$0xff] }
  0x58   : > { %1310 = vmatpush3.bf16.msra.mxu0 %v464_v36  ;;  %1401 = vmatpush3.bf16.msra.mxu1 %v464_v36  ;;  %v396_v21 = vld [vmem:[#allocation5 + $0x138] sm:$0xff]  ;;  %v412_v24 = vpack.c.bf16 %v372_v19, %v370_v16  ;;  %v371_v27 = vld [vmem:[#allocation5 + $0x70] sm:$0xff]  ;;  %v374_v28 = vld [vmem:[#allocation5 + $0x88] sm:$0xff] }
  0x59   : > { %1311 = vmatprep.subr.bf16.mxu0 %v471_v38  ;;  %1394 = vmatprep.subr.bf16.mxu1 %v471_v38  ;;  %v424_v25 = vpack.c.bf16 %v396_v21, %v394_v20  ;;  %v393_v29 = vld [vmem:[#allocation5 + $0x120] sm:$0xff]  ;;  %v395_v30 = vld [vmem:[#allocation5 + $0x130] sm:$0xff]  ;;  %v376_v31 = vld [vmem:[#allocation5 + $0x98] sm:$0xff]  ;;  %v411_v34 = vpack.c.bf16 %v371_v27, %v369_v26 }
  0x5a   : > { %v398_v32 = vld [vmem:[#allocation5 + $0x148] sm:$0xff]  ;;  %v400_v33 = vld [vmem:[#allocation5 + $0x158] sm:$0xff]  ;;  %v423_v35 = vpack.c.bf16 %v395_v30, %v393_v29  ;;  %v414_v36 = vpack.c.bf16 %v376_v31, %v374_v28  ;;  %v373_v38 = vld [vmem:[#allocation5 + $0x80] sm:$0xff] }
  0x5b   : > { %v426_v37 = vpack.c.bf16 %v400_v33, %v398_v32  ;;  %v375_v39 = vld [vmem:[#allocation5 + $0x90] sm:$0xff]  ;;  %v378_v40 = vld [vmem:[#allocation5 + $0xa8] sm:$0xff]  ;;  %v397_v41 = vld [vmem:[#allocation5 + $0x140] sm:$0xff] }
  0x5c   : > { %1312 = vmatpush3.bf16.msra.mxu0 %v463_v43  ;;  %1402 = vmatpush3.bf16.msra.mxu1 %v463_v43  ;;  %v399_v42 = vld [vmem:[#allocation5 + $0x150] sm:$0xff]  ;;  %v380_v43 = vld [vmem:[#allocation5 + $0xb8] sm:$0xff]  ;;  %v413_v46 = vpack.c.bf16 %v375_v39, %v373_v38  ;;  %v401_v52 = vld [vmem:[#allocation5 + $0x160] sm:$0xff] }
  0x5d   : > { %1313 = vmatprep.subr.bf16.mxu0 %v470_v44  ;;  %1395 = vmatprep.subr.bf16.mxu1 %v470_v44  ;;  %v402_v44 = vld [vmem:[#allocation5 + $0x168] sm:$0xff]  ;;  %v404_v45 = vld [vmem:[#allocation5 + $0x178] sm:$0xff]  ;;  %v425_v47 = vpack.c.bf16 %v399_v42, %v397_v41  ;;  %v416_v48 = vpack.c.bf16 %v380_v43, %v378_v40  ;;  %v379_v51 = vld [vmem:[#allocation5 + $0xb0] sm:$0xff] }
  0x5e   : > { %v403_v53 = vld [vmem:[#allocation5 + $0x170] sm:$0xff]  ;;  %v1770_v59 = vld [vmem:[%s2031_s2] ss:$0 sm:$0xff] }
  0x60   : > { %1314 = vmatpush3.bf16.msra.mxu0 %v462_v49  ;;  %1403 = vmatpush3.bf16.msra.mxu1 %v462_v49  ;;  %v428_v49 = vpack.c.bf16 %v404_v45, %v402_v44 }
  0x61   : > { %1315 = vmatprep.subr.bf16.mxu0 %v469_v50  ;;  %1396 = vmatprep.subr.bf16.mxu1 %v469_v50  ;;  %v377_v50 = vld [vmem:[#allocation5 + $0xa0] sm:$0xff] }
  0x62   : > { %v415_v54 = vpack.c.bf16 %v379_v51, %v377_v50 }
  0x64   : > { %1316 = vmatpush3.bf16.msra.mxu0 %v461_v55  ;;  %1404 = vmatpush3.bf16.msra.mxu1 %v461_v55  ;;  %v427_v55 = vpack.c.bf16 %v403_v53, %v401_v52 }
  0x67   : > { %517 = vmatmul.mubr.bf16.vlgmr.msra.gmra.mxu0 %v405_v62  ;;  %565 = vmatmul.mubr.bf16.vlgmr.msra.gmra.mxu1 %v417_v63 }
  0x68   : > { %524 = vmatprep.mubr.bf16.mxu0 %v408_v0  ;;  %572 = vmatprep.mubr.bf16.mxu1 %v420_v1 }
  0x6f   : > { %525 = vmatmul.mubr.bf16.gmra.mxu0 %v407_v10  ;;  %573 = vmatmul.mubr.bf16.gmra.mxu1 %v419_v11 }
  0x70   : > { %532 = vmatprep.mubr.bf16.mxu0 %v410_v12  ;;  %580 = vmatprep.mubr.bf16.mxu1 %v422_v13 }
  0x77   : > { %533 = vmatmul.mubr.bf16.gmra.mxu0 %v409_v22  ;;  %581 = vmatmul.mubr.bf16.gmra.mxu1 %v421_v23 }
  0x78   : > { %540 = vmatprep.mubr.bf16.mxu0 %v412_v24  ;;  %588 = vmatprep.mubr.bf16.mxu1 %v424_v25 }
  0x7f   : > { %541 = vmatmul.mubr.bf16.gmra.mxu0 %v411_v34  ;;  %589 = vmatmul.mubr.bf16.gmra.mxu1 %v423_v35 }
  0x80   : > { %548 = vmatprep.mubr.bf16.mxu0 %v414_v36  ;;  %596 = vmatprep.mubr.bf16.mxu1 %v426_v37 }
  0x87   : > { %549 = vmatmul.mubr.bf16.gmra.mxu0 %v413_v46  ;;  %597 = vmatmul.mubr.bf16.gmra.mxu1 %v425_v47 }
  0x88   : > { %556 = vmatprep.mubr.bf16.mxu0 %v416_v48  ;;  %604 = vmatprep.mubr.bf16.mxu1 %v428_v49 }
  0x8f   : > { %557 = vmatmul.mubr.bf16.gmra.mxu0 %v415_v54  ;;  %605 = vmatmul.mubr.bf16.gmra.mxu1 %v427_v55 }
 0x127   : > { %v1317_v57 = vpop.f32.mrf.mxu0  ;;  %v1353_v58 = vpop.f32.mrf.mxu1 }
 0x129   : > { %v1318_v60 = vpop.f32.mrf.mxu0  ;;  %v1354_v61 = vpop.f32.mrf.mxu1 }
 0x12a   : > { %v1319_v62 = vadd.f32 %v1318_v60, %v1317_v57  ;;  %v1355_v63 = vadd.f32 %v1354_v61, %v1353_v58 }
 0x12b   : > { %v1320_v0 = vpop.f32.mrf.mxu0  ;;  %v1356_v1 = vpop.f32.mrf.mxu1 }
 0x12c   : > { %v1773_v2 = vadd.f32 %v1319_v62, %v1770_v59  ;;  %v1776_v3 = vadd.f32 %v1355_v63, %v1770_v59 }
 0x12d   : > { %v1321_v4 = vpop.f32.mrf.mxu0  ;;  %v1357_v5 = vpop.f32.mrf.mxu1 }
 0x12e   : > { %615 = vst [vmem:[#allocation2 + $0xb0] sm:$0xff] %v1773_v2  ;;  %v1322_v6 = vadd.f32 %v1321_v4, %v1320_v0  ;;  %627 = vst [vmem:[#allocation2 + $0x38] sm:$0xff] %v1776_v3  ;;  %v1358_v7 = vadd.f32 %v1357_v5, %v1356_v1  ;;  %v668_v52 = vmul.f32 %v1773_v2, %v1773_v2 }
 0x12f   : > { %v1323_v8 = vpop.f32.mrf.mxu0  ;;  %v1359_v9 = vpop.f32.mrf.mxu1 }
 0x130   : > { %v522_v10 = vadd.f32 %v1322_v6, %v1770_v59  ;;  %v1782_v11 = vadd.f32 %v1358_v7, %v1770_v59 }
 0x131   : > { %v1324_v12 = vpop.f32.mrf.mxu0  ;;  %v1360_v13 = vpop.f32.mrf.mxu1 }
 0x132   : > { %616 = vst [vmem:[#allocation2] sm:$0xff] %v522_v10  ;;  %v1325_v14 = vadd.f32 %v1324_v12, %v1323_v8  ;;  %628 = vst [vmem:[#allocation2 + $0x50] sm:$0xff] %v1782_v11  ;;  %v1361_v16 = vadd.f32 %v1360_v13, %v1359_v9  ;;  %v669_v47 = vmul.f32 %v522_v10, %v522_v10 }
 0x133   : > { %v1326_v15 = vpop.f32.mrf.mxu0  ;;  %v1362_v17 = vpop.f32.mrf.mxu1  ;;  %v639_v57 = vadd.f32 %v522_v10, %v1773_v2 }
 0x134   : > { %v527_v18 = vadd.f32 %v1325_v14, %v1770_v59  ;;  %v1787_v20 = vadd.f32 %v1361_v16, %v1770_v59  ;;  %v692_v61 = vadd.f32 %v669_v47, %v668_v52 }
 0x135   : > { %v1327_v19 = vpop.f32.mrf.mxu0  ;;  %v1363_v21 = vpop.f32.mrf.mxu1 }
 0x136   : > { %617 = vst [vmem:[#allocation2 + $0x10] sm:$0xff] %v527_v18  ;;  %v1328_v22 = vadd.f32 %v1327_v19, %v1326_v15  ;;  %v1364_v23 = vadd.f32 %v1363_v21, %v1362_v17  ;;  %629 = vst [vmem:[#allocation2 + $0x70] sm:$0xff] %v1787_v20  ;;  %v670_v53 = vmul.f32 %v527_v18, %v527_v18 }
 0x137   : > { %v1329_v24 = vpop.f32.mrf.mxu0  ;;  %v1365_v25 = vpop.f32.mrf.mxu1  ;;  %v640_v1 = vadd.f32 %v639_v57, %v527_v18 }
 0x138   : > { %v530_v26 = vadd.f32 %v1328_v22, %v1770_v59  ;;  %v1792_v27 = vadd.f32 %v1364_v23, %v1770_v59  ;;  %v693_v6 = vadd.f32 %v692_v61, %v670_v53 }
 0x139   : > { %v1330_v28 = vpop.f32.mrf.mxu0  ;;  %v1366_v29 = vpop.f32.mrf.mxu1 }
 0x13a   : > { %618 = vst [vmem:[#allocation2 + $0x48] sm:$0xff] %v530_v26  ;;  %v1331_v30 = vadd.f32 %v1330_v28, %v1329_v24  ;;  %630 = vst [vmem:[#allocation2 + $0xa0] sm:$0xff] %v1792_v27  ;;  %v1367_v32 = vadd.f32 %v1366_v29, %v1365_v25  ;;  %v671_v62 = vmul.f32 %v530_v26, %v530_v26 }
 0x13b   : > { %v1332_v31 = vpop.f32.mrf.mxu0  ;;  %v1368_v33 = vpop.f32.mrf.mxu1  ;;  %v641_v2 = vadd.f32 %v640_v1, %v530_v26 }
 0x13c   : > { %v535_v34 = vadd.f32 %v1331_v30, %v1770_v59  ;;  %v1797_v36 = vadd.f32 %v1367_v32, %v1770_v59  ;;  %v694_v12 = vadd.f32 %v693_v6, %v671_v62 }
 0x13d   : > { %v1333_v35 = vpop.f32.mrf.mxu0  ;;  %v1369_v37 = vpop.f32.mrf.mxu1 }
 0x13e   : > { %619 = vst [vmem:[#allocation2 + $0x60] sm:$0xff] %v535_v34  ;;  %v1334_v38 = vadd.f32 %v1333_v35, %v1332_v31  ;;  %v1370_v39 = vadd.f32 %v1369_v37, %v1368_v33  ;;  %631 = vst [vmem:[#allocation2 + $0xa8] sm:$0xff] %v1797_v36  ;;  %v672_v7 = vmul.f32 %v535_v34, %v535_v34 }
 0x13f   : > { %v1335_v40 = vpop.f32.mrf.mxu0  ;;  %v1371_v41 = vpop.f32.mrf.mxu1  ;;  %v642_v17 = vadd.f32 %v641_v2, %v535_v34  ;;  %v681_v2 = vmul.f32 %v1782_v11, %v1782_v11 }
 0x140   : > { %v538_v42 = vadd.f32 %v1334_v38, %v1770_v59  ;;  %v1802_v43 = vadd.f32 %v1370_v39, %v1770_v59  ;;  %v695_v19 = vadd.f32 %v694_v12, %v672_v7  ;;  %v680_v7 = vmul.f32 %v1776_v3, %v1776_v3 }
 0x141   : > { %v1336_v44 = vpop.f32.mrf.mxu0  ;;  %v1372_v45 = vpop.f32.mrf.mxu1 }
 0x142   : > { %620 = vst [vmem:[#allocation2 + $0x28] sm:$0xff] %v538_v42  ;;  %v1337_v46 = vadd.f32 %v1336_v44, %v1335_v40  ;;  %632 = vst [vmem:[#allocation2 + $0x68] sm:$0xff] %v1802_v43  ;;  %v1373_v49 = vadd.f32 %v1372_v45, %v1371_v41  ;;  %v673_v13 = vmul.f32 %v538_v42, %v538_v42 }
 0x143   : > { %v1338_v48 = vpop.f32.mrf.mxu0  ;;  %v1374_v50 = vpop.f32.mrf.mxu1  ;;  %v643_v25 = vadd.f32 %v642_v17, %v538_v42 }
 0x144   : > { %v543_v51 = vadd.f32 %v1337_v46, %v1770_v59  ;;  %v1809_v55 = vadd.f32 %v1373_v49, %v1770_v59  ;;  %v696_v29 = vadd.f32 %v695_v19, %v673_v13 }
 0x145   : > { %v1339_v54 = vpop.f32.mrf.mxu0  ;;  %v1375_v56 = vpop.f32.mrf.mxu1 }
 0x146   : > { %621 = vst [vmem:[#allocation2 + $0x40] sm:$0xff] %v543_v51  ;;  %v1340_v58 = vadd.f32 %v1339_v54, %v1338_v48  ;;  %v1376_v60 = vadd.f32 %v1375_v56, %v1374_v50  ;;  %633 = vst [vmem:[#allocation2 + $0x30] sm:$0xff] %v1809_v55  ;;  %v674_v21 = vmul.f32 %v543_v51, %v543_v51 }
 0x147   : > { %v1341_v63 = vpop.f32.mrf.mxu0  ;;  %v1377_v0 = vpop.f32.mrf.mxu1  ;;  %v644_v33 = vadd.f32 %v643_v25, %v543_v51 }
 0x148   : > { %v546_v4 = vadd.f32 %v1340_v58, %v1770_v59  ;;  %v1815_v5 = vadd.f32 %v1376_v60, %v1770_v59  ;;  %v697_v37 = vadd.f32 %v696_v29, %v674_v21 }
 0x149   : > { %v1342_v8 = vpop.f32.mrf.mxu0  ;;  %v1378_v9 = vpop.f32.mrf.mxu1 }
 0x14a   : > { %622 = vst [vmem:[#allocation2 + $0x78] sm:$0xff] %v546_v4  ;;  %v1343_v10 = vadd.f32 %v1342_v8, %v1341_v63  ;;  %634 = vst [vmem:[#allocation2 + $0x58] sm:$0xff] %v1815_v5  ;;  %v1379_v15 = vadd.f32 %v1378_v9, %v1377_v0  ;;  %v675_v30 = vmul.f32 %v546_v4, %v546_v4 }
 0x14b   : > { %v1344_v14 = vpop.f32.mrf.mxu0  ;;  %v1380_v16 = vpop.f32.mrf.mxu1  ;;  %v645_v41 = vadd.f32 %v644_v33, %v546_v4 }
 0x14c   : > { %v551_v18 = vadd.f32 %v1343_v10, %v1770_v59  ;;  %v1820_v23 = vadd.f32 %v1379_v15, %v1770_v59  ;;  %v698_v44 = vadd.f32 %v697_v37, %v675_v30  ;;  %v683_v15 = vmul.f32 %v1792_v27, %v1792_v27 }
 0x14d   : > { %v1345_v22 = vpop.f32.mrf.mxu0  ;;  %v1381_v24 = vpop.f32.mrf.mxu1 }
 0x14e   : > { %623 = vst [vmem:[#allocation2 + $0x88] sm:$0xff] %v551_v18  ;;  %v1346_v26 = vadd.f32 %v1345_v22, %v1344_v14  ;;  %v1382_v28 = vadd.f32 %v1381_v24, %v1380_v16  ;;  %635 = vst [vmem:[#allocation2 + $0x80] sm:$0xff] %v1820_v23  ;;  %v676_v38 = vmul.f32 %v551_v18, %v551_v18 }
 0x14f   : > { %v1347_v31 = vpop.f32.mrf.mxu0  ;;  %v1383_v32 = vpop.f32.mrf.mxu1  ;;  %v646_v48 = vadd.f32 %v645_v41, %v551_v18  ;;  %v688_v30 = vmul.f32 %v1820_v23, %v1820_v23 }
 0x150   : > { %v554_v34 = vadd.f32 %v1346_v26, %v1770_v59  ;;  %v1825_v35 = vadd.f32 %v1382_v28, %v1770_v59  ;;  %v699_v51 = vadd.f32 %v698_v44, %v676_v38  ;;  %v687_v26 = vmul.f32 %v1815_v5, %v1815_v5 }
 0x151   : > { %v1348_v39 = vpop.f32.mrf.mxu0  ;;  %v1384_v40 = vpop.f32.mrf.mxu1 }
 0x152   : > { %624 = vst [vmem:[#allocation2 + $0x90] sm:$0xff] %v554_v34  ;;  %v1349_v42 = vadd.f32 %v1348_v39, %v1347_v31  ;;  %636 = vst [vmem:[#allocation2 + $0xb8] sm:$0xff] %v1825_v35  ;;  %v1385_v46 = vadd.f32 %v1384_v40, %v1383_v32  ;;  %v677_v49 = vmul.f32 %v554_v34, %v554_v34 }
 0x153   : > { %v1350_v45 = vpop.f32.mrf.mxu0  ;;  %v1386_v47 = vpop.f32.mrf.mxu1  ;;  %v647_v56 = vadd.f32 %v646_v48, %v554_v34  ;;  %v689_v32 = vmul.f32 %v1825_v35, %v1825_v35 }
 0x154   : > { %v559_v50 = vadd.f32 %v1349_v42, %v1770_v59  ;;  %v607_v53 = vadd.f32 %v1385_v46, %v1770_v59  ;;  %v700_v61 = vadd.f32 %v699_v51, %v677_v49  ;;  %v728_v51 = vld [vmem:[#allocation3] sm:$0x3] }
 0x155   : > { %v1351_v52 = vpop.f32.mrf.mxu0  ;;  %v1387_v54 = vpop.f32.mrf.mxu1 }
 0x156   : > { %625 = vst [vmem:[#allocation2 + $0x18] sm:$0xff] %v559_v50  ;;  %v678_v57 = vmul.f32 %v559_v50, %v559_v50  ;;  %v1352_v58 = vadd.f32 %v1351_v52, %v1350_v45  ;;  %v1388_v60 = vadd.f32 %v1387_v54, %v1386_v47  ;;  %637 = vst [vmem:[#allocation2 + $0x20] sm:$0xff] %v607_v53 }
 0x157   : > { %v648_v62 = vadd.f32 %v647_v56, %v559_v50  ;;  %v690_v34 = vmul.f32 %v607_v53, %v607_v53 }
 0x158   : > { %v562_v63 = vadd.f32 %v1352_v58, %v1770_v59  ;;  %v610_v0 = vadd.f32 %v1388_v60, %v1770_v59  ;;  %v701_v1 = vadd.f32 %v700_v61, %v678_v57  ;;  %v682_v59 = vmul.f32 %v1787_v20, %v1787_v20 }
 0x15a   : > { %626 = vst [vmem:[#allocation2 + $0x98] sm:$0xff] %v562_v63  ;;  %v649_v4 = vadd.f32 %v648_v62, %v562_v63  ;;  %v679_v6 = vmul.f32 %v562_v63, %v562_v63  ;;  %638 = vst [vmem:[#allocation2 + $0x8] sm:$0xff] %v610_v0  ;;  %v691_v39 = vmul.f32 %v610_v0, %v610_v0 }
 0x15c   : > { %v650_v8 = vadd.f32 %v649_v4, %v1776_v3  ;;  %v702_v9 = vadd.f32 %v701_v1, %v679_v6  ;;  %v684_v3 = vmul.f32 %v1797_v36, %v1797_v36 }
 0x15e   : > { %v651_v10 = vadd.f32 %v650_v8, %v1782_v11  ;;  %v703_v12 = vadd.f32 %v702_v9, %v680_v7  ;;  %v685_v11 = vmul.f32 %v1802_v43, %v1802_v43 }
 0x160   : > { %v652_v13 = vadd.f32 %v651_v10, %v1787_v20  ;;  %v704_v14 = vadd.f32 %v703_v12, %v681_v2  ;;  %v686_v20 = vmul.f32 %v1809_v55, %v1809_v55 }
 0x162   : > { %v705_v16 = vadd.f32 %v704_v14, %v682_v59  ;;  %v653_v17 = vadd.f32 %v652_v13, %v1792_v27 }
 0x164   : > { %v654_v18 = vadd.f32 %v653_v17, %v1797_v36  ;;  %v706_v19 = vadd.f32 %v705_v16, %v683_v15 }
 0x166   : > { %v655_v21 = vadd.f32 %v654_v18, %v1802_v43  ;;  %v707_v22 = vadd.f32 %v706_v19, %v684_v3 }
 0x168   : > { %v656_v24 = vadd.f32 %v655_v21, %v1809_v55  ;;  %v708_v25 = vadd.f32 %v707_v22, %v685_v11 }
 0x16a   : > { %v657_v27 = vadd.f32 %v656_v24, %v1815_v5  ;;  %v709_v28 = vadd.f32 %v708_v25, %v686_v20 }
 0x16c   : > { %v710_v36 = vadd.f32 %v709_v28, %v687_v26  ;;  %v658_v29 = vadd.f32 %v657_v27, %v1820_v23 }
 0x16e   : > { %v711_v43 = vadd.f32 %v710_v36, %v688_v30  ;;  %v659_v31 = vadd.f32 %v658_v29, %v1825_v35 }
 0x170   : > { %v712_v55 = vadd.f32 %v711_v43, %v689_v32  ;;  %v660_v33 = vadd.f32 %v659_v31, %v607_v53 }
 0x172   : > { %v713_v37 = vadd.f32 %v712_v55, %v690_v34  ;;  %v661_v38 = vadd.f32 %v660_v33, %v610_v0 }
 0x174   : > { %v662_v5 = vrot.slane %v661_v38, 4  ;;  %v714_v40 = vadd.f32 %v713_v37, %v691_v39 }
 0x176   : > { %v663_v41 = vadd.f32 %v662_v5, %v661_v38  ;;  %v715_v42 = vrot.slane %v714_v40, 4 }
 0x178   : > { %v664_v44 = vrot.slane %v663_v41, 2  ;;  %v716_v45 = vadd.f32 %v715_v42, %v714_v40 }
 0x17a   : > { %v665_v46 = vadd.f32 %v664_v44, %v663_v41  ;;  %v717_v23 = vrot.slane %v716_v45, 2 }
 0x17c   : > { %v666_v47 = vrot.slane %v665_v46, 1  ;;  %v718_v48 = vadd.f32 %v717_v23, %v716_v45 }
 0x17e   : > { %v719_v49 = vrot.slane %v718_v48, 1  ;;  %v667_v50 = vadd.f32 %v666_v47, %v665_v46 }
 0x180   : > { %v720_v35 = vadd.f32 %v719_v49, %v718_v48 }
 0x182   : > { %v722_v52 = vsel %vm721_vm0, %v667_v50, %v720_v35 }
 0x183   : > { %v729_v53 = vadd.f32 %v728_v51, %v722_v52 }
 0x185   : > { %730 = vst [vmem:[#allocation3] sm:$0x3] %v729_v53 }
 0x186 PF: > { %p1294_p3 = scmp.ne.s32.totalorder %s1629_s24, 1 }
 0x188   : > { %734 = sbr.rel (%p1294_p3) target bundleno = 703 (0x2bf), region = 72 }
 0x18d   : > { %v929_v54 = vld [vmem:[#allocation10 + $0xe8] sm:$0xff]  ;;  %v931_v56 = vld [vmem:[#allocation10 + $0xf8] sm:$0xff]  ;;  %v928_v57 = vld [vmem:[#allocation10 + $0xe0] sm:$0xff]  ;;  %v1647_v63 = vmov 0   ;;  %v1648_v23 = vmov 1966171168   ;;  %v755_v48 = vlaneseq }
 0x18e   : > { %v947_v58 = vpack.c.bf16 %v931_v56, %v929_v54  ;;  %v930_v60 = vld [vmem:[#allocation10 + $0xf0] sm:$0xff]  ;;  %v925_v61 = vld [vmem:[#allocation10 + $0xc8] sm:$0xff]  ;;  %v927_v62 = vld [vmem:[#allocation10 + $0xd8] sm:$0xff]  ;;  %992 = vmatprep.mubr.bf16.mxu0 %v1647_v63  ;;  %1052 = vmatprep.mubr.bf16.mxu1 %v1647_v63  ;;  %v753_v47 = vunpack.c.l.s4 %v1648_v23  ;;  %vm777_vm1 = vcmask 1040384  }
 0x18f   : > { %v946_v0 = vpack.c.bf16 %v930_v60, %v928_v57  ;;  %v945_v1 = vpack.c.bf16 %v927_v62, %v925_v61  ;;  %v924_v4 = vld [vmem:[#allocation10 + $0xc0] sm:$0xff]  ;;  %v926_v6 = vld [vmem:[#allocation10 + $0xd0] sm:$0xff]  ;;  %v921_v7 = vld [vmem:[#allocation10 + $0xa8] sm:$0xff]  ;;  %v1870_v35 = vshrl.u32 %v755_v48, 7 }
 0x190   : > { %960 = vmatprep.subr.bf16.mxu0 %v947_v58  ;;  %1405 = vmatprep.subr.bf16.mxu1 %v947_v58  ;;  %v923_v8 = vld [vmem:[#allocation10 + $0xb8] sm:$0xff]  ;;  %v944_v9 = vpack.c.bf16 %v926_v6, %v924_v4  ;;  %v920_v10 = vld [vmem:[#allocation10 + $0xa0] sm:$0xff]  ;;  %v922_v12 = vld [vmem:[#allocation10 + $0xb0] sm:$0xff]  ;;  %v754_v50 = vunpack.c.0.s8 %v753_v47 }
 0x191   : > { %961 = vmatpush1.bf16.msra.mxu0 %v946_v0  ;;  %1413 = vmatpush1.bf16.msra.mxu1 %v946_v0  ;;  %v943_v2 = vpack.c.bf16 %v923_v8, %v921_v7  ;;  %v917_v59 = vld [vmem:[#allocation10 + $0x88] sm:$0xff]  ;;  %v919_v13 = vld [vmem:[#allocation10 + $0x98] sm:$0xff]  ;;  %v942_v14 = vpack.c.bf16 %v922_v12, %v920_v10  ;;  %v916_v16 = vld [vmem:[#allocation10 + $0x80] sm:$0xff]  ;;  %v774_v62 = vsub.s32 0, %v1870_v35 }
 0x192   : > { %962 = vmatprep.subr.bf16.mxu0 %v945_v1  ;;  %1406 = vmatprep.subr.bf16.mxu1 %v945_v1  ;;  %v941_v15 = vpack.c.bf16 %v919_v13, %v917_v59  ;;  %v918_v17 = vld [vmem:[#allocation10 + $0x90] sm:$0xff]  ;;  %v913_v3 = vld [vmem:[#allocation10 + $0x68] sm:$0xff]  ;;  %v915_v18 = vld [vmem:[#allocation10 + $0x78] sm:$0xff]  ;;  %v757_v51 = vsub.s32 %v754_v50, %v1870_v35 }
 0x193   : > { %v739_v19 = vld [vmem:[#allocation3] sm:$0x3]  ;;  %v940_v21 = vpack.c.bf16 %v918_v17, %v916_v16  ;;  %v939_v22 = vpack.c.bf16 %v915_v18, %v913_v3  ;;  %v912_v20 = vld [vmem:[#allocation10 + $0x60] sm:$0xff]  ;;  %v914_v24 = vld [vmem:[#allocation10 + $0x70] sm:$0xff] }
 0x194   : > { %v1865_v11 = vmul.f32 0.0052083335, %v739_v19  ;;  %v909_v27 = vld [vmem:[#allocation10 + $0x48] sm:$0xff]  ;;  %v911_v26 = vld [vmem:[#allocation10 + $0x58] sm:$0xff]  ;;  %v938_v36 = vpack.c.bf16 %v914_v24, %v912_v20  ;;  %v908_v30 = vld [vmem:[#allocation10 + $0x40] sm:$0xff] }
 0x195   : > { %963 = vmatpush1.bf16.msra.mxu0 %v944_v9  ;;  %1414 = vmatpush1.bf16.msra.mxu1 %v944_v9  ;;  %v937_v29 = vpack.c.bf16 %v911_v26, %v909_v27  ;;  %v910_v43 = vld [vmem:[#allocation10 + $0x50] sm:$0xff]  ;;  %v905_v32 = vld [vmem:[#allocation10 + $0x28] sm:$0xff]  ;;  %v907_v55 = vld [vmem:[#allocation10 + $0x38] sm:$0xff] }
 0x196   : > { %964 = vmatprep.subr.bf16.mxu0 %v943_v2  ;;  %1407 = vmatprep.subr.bf16.mxu1 %v943_v2  ;;  %v743_v25 = vmul.f32 %v1865_v11, %v1865_v11  ;;  %v936_v34 = vpack.c.bf16 %v910_v43, %v908_v30  ;;  %v935_v37 = vpack.c.bf16 %v907_v55, %v905_v32  ;;  %v904_v38 = vld [vmem:[#allocation10 + $0x20] sm:$0xff]  ;;  %v906_v39 = vld [vmem:[#allocation10 + $0x30] sm:$0xff]  ;;  %v901_v40 = vld [vmem:[#allocation10 + $0x8] sm:$0xff] }
 0x197   : > { %v903_v41 = vld [vmem:[#allocation10 + $0x18] sm:$0xff]  ;;  %v934_v42 = vpack.c.bf16 %v906_v39, %v904_v38  ;;  %v900_v45 = vld [vmem:[#allocation10] sm:$0xff]  ;;  %v902_v46 = vld [vmem:[#allocation10 + $0x10] sm:$0xff] }
 0x198   : > { %v745_v28 = vrot.slane %v743_v25, 7  ;;  %v933_v44 = vpack.c.bf16 %v903_v41, %v901_v40  ;;  %v932_v49 = vpack.c.bf16 %v902_v46, %v900_v45  ;;  %v740_v56 = vld [vmem:[%s2032_s3] sm:$0x1]  ;;  %v782_v6 = vld [vmem:[#allocation2 + $0xb0] sm:$0xff]  ;;  %v794_v8 = vld [vmem:[#allocation2 + $0x38] sm:$0xff] }
 0x199   : > { %965 = vmatpush1.bf16.msra.mxu0 %v942_v14  ;;  %1415 = vmatpush1.bf16.msra.mxu1 %v942_v14  ;;  %v741_v60 = vld [vmem:[%s2033_s4] sm:$0x1]  ;;  %v795_v9 = vld [vmem:[#allocation2 + $0x50] sm:$0xff]  ;;  %v785_v10 = vld [vmem:[#allocation2 + $0x48] sm:$0xff] }
 0x19a   : > { %966 = vmatprep.subr.bf16.mxu0 %v941_v15  ;;  %1408 = vmatprep.subr.bf16.mxu1 %v941_v15  ;;  %v747_v31 = vsub.f32 %v1865_v11, %v745_v28  ;;  %v783_v7 = vld [vmem:[#allocation2] sm:$0xff]  ;;  %v784_v2 = vld [vmem:[#allocation2 + $0x10] sm:$0xff]  ;;  %v787_v55 = vld [vmem:[#allocation2 + $0x28] sm:$0xff] }
 0x19b   : > { %v796_v12 = vld [vmem:[#allocation2 + $0x70] sm:$0xff]  ;;  %v797_v59 = vld [vmem:[#allocation2 + $0xa0] sm:$0xff] }
 0x19c   : > { %v748_v33 = vmax.f32 %v747_v31, 0.0  ;;  %v786_v32 = vld [vmem:[#allocation2 + $0x60] sm:$0xff] }
 0x19d   : > { %967 = vmatpush1.bf16.msra.mxu0 %v940_v21  ;;  %1416 = vmatpush1.bf16.msra.mxu1 %v940_v21 }
 0x19e   : > { %968 = vmatprep.subr.bf16.mxu0 %v939_v22  ;;  %1409 = vmatprep.subr.bf16.mxu1 %v939_v22  ;;  %v749_v5 = vadd.f32 1e-05, %v748_v33  ;;  %v798_v33 = vld [vmem:[#allocation2 + $0xa8] sm:$0xff] }
 0x1a0   : > { %1499 = vrsqrt.f32 %v749_v5 }
 0x1a1   : > { %969 = vmatpush1.bf16.msra.mxu0 %v938_v36  ;;  %1417 = vmatpush1.bf16.msra.mxu1 %v938_v36 }
 0x1a2   : > { %970 = vmatprep.subr.bf16.mxu0 %v937_v29  ;;  %1410 = vmatprep.subr.bf16.mxu1 %v937_v29 }
 0x1a5   : > { %971 = vmatpush1.bf16.msra.mxu0 %v936_v34  ;;  %1418 = vmatpush1.bf16.msra.mxu1 %v936_v34  ;;  %v799_v34 = vld [vmem:[#allocation2 + $0x68] sm:$0xff] }
 0x1a6   : > { %972 = vmatprep.subr.bf16.mxu0 %v935_v37  ;;  %1411 = vmatprep.subr.bf16.mxu1 %v935_v37 }
 0x1a9   : > { %973 = vmatpush1.bf16.msra.mxu0 %v934_v42  ;;  %1419 = vmatpush1.bf16.msra.mxu1 %v934_v42 }
 0x1aa   : > { %974 = vmatprep.subr.bf16.mxu0 %v933_v44  ;;  %1412 = vmatprep.subr.bf16.mxu1 %v933_v44 }
 0x1ad   : > { %975 = vmatpush1.bf16.msra.mxu0 %v932_v49  ;;  %1420 = vmatpush1.bf16.msra.mxu1 %v932_v49  ;;  %v1500_v52 = vpop.eup %1499 }
 0x1ae   : > { %v758_v53 = vrot.slane %v1500_v52, %v757_v51  ;;  %v788_v52 = vld [vmem:[#allocation2 + $0x40] sm:$0xff] }
 0x1b0   : > { %v759_v54 = vcombine.high %v758_v53, %v758_v53  ;;  %v789_v53 = vld [vmem:[#allocation2 + $0x78] sm:$0xff] }
 0x1b2   : > { %v766_v57 = vrot.slane %v759_v54, %v757_v51  ;;  %v800_v54 = vld [vmem:[#allocation2 + $0x30] sm:$0xff] }
 0x1b4   : > { %v768_v58 = vmul.f32 %v766_v57, %v740_v56  ;;  %v801_v56 = vld [vmem:[#allocation2 + $0x58] sm:$0xff] }
 0x1b6   : > { %v769_v61 = vmul.f32 %v768_v58, %v1865_v11 }
 0x1b8   : > { %v770_v0 = vsub.f32 %v741_v60, %v769_v61 }
 0x1ba   : > { %v775_v1 = vrot.slane %v770_v0, %v774_v62 }
 0x1bc   : > { %v778_v4 = vsel %vm777_vm1, %v768_v58, %v775_v1 }
 0x1bd   : > { %779 = vst [vmem:[#allocation4] sm:$0x3] %v778_v4 }
 0x1c4   : > { %v1883_v13 = vld [vmem:[#allocation4] ss:$0 sm:$0xff]  ;;  %v1885_v14 = vld [vmem:[#allocation4 + $0x1] ss:$0 sm:$0xff] }
 0x1c5   : > { %v811_v15 = vmul.f32 %v1883_v13, %v782_v6  ;;  %v812_v16 = vmul.f32 %v1883_v13, %v783_v7  ;;  %v823_v17 = vmul.f32 %v1883_v13, %v794_v8  ;;  %v824_v3 = vmul.f32 %v1883_v13, %v795_v9 }
 0x1c6   : > { %v813_v18 = vmul.f32 %v1883_v13, %v784_v2  ;;  %v814_v19 = vmul.f32 %v1883_v13, %v785_v10  ;;  %v825_v11 = vmul.f32 %v1883_v13, %v796_v12  ;;  %v826_v21 = vmul.f32 %v1883_v13, %v797_v59  ;;  %v790_v59 = vld [vmem:[#allocation2 + $0x88] sm:$0xff] }
 0x1c7   : > { %v840_v22 = vadd.f32 %v1885_v14, %v811_v15  ;;  %v841_v20 = vadd.f32 %v1885_v14, %v812_v16  ;;  %v852_v24 = vadd.f32 %v1885_v14, %v823_v17  ;;  %v853_v25 = vadd.f32 %v1885_v14, %v824_v3  ;;  %v791_v15 = vld [vmem:[#allocation2 + $0x90] sm:$0xff]  ;;  %v802_v16 = vld [vmem:[#allocation2 + $0x80] sm:$0xff]  ;;  %v803_v17 = vld [vmem:[#allocation2 + $0xb8] sm:$0xff] }
 0x1c8   : > { %v842_v27 = vadd.f32 %v1885_v14, %v813_v18  ;;  %v843_v26 = vadd.f32 %v1885_v14, %v814_v19  ;;  %v854_v28 = vadd.f32 %v1885_v14, %v825_v11  ;;  %v855_v36 = vadd.f32 %v1885_v14, %v826_v21 }
 0x1c9   : > { %v864_v29 = vmax.f32 %v840_v22, 0.0  ;;  %v865_v30 = vmax.f32 %v841_v20, 0.0  ;;  %v876_v43 = vmax.f32 %v852_v24, 0.0  ;;  %v877_v31 = vmax.f32 %v853_v25, 0.0 }
 0x1ca   : > { %v866_v39 = vmax.f32 %v842_v27, 0.0  ;;  %v867_v5 = vmax.f32 %v843_v26, 0.0  ;;  %v815_v40 = vmul.f32 %v1883_v13, %v786_v32  ;;  %v816_v41 = vmul.f32 %v1883_v13, %v787_v55  ;;  %v805_v32 = vld [vmem:[#allocation2 + $0x8] sm:$0xff] }
 0x1cb   : > { %v888_v37 = vpack.c.bf16 %v865_v30, %v864_v29  ;;  %v894_v38 = vpack.c.bf16 %v877_v31, %v876_v43  ;;  %v878_v42 = vmax.f32 %v854_v28, 0.0  ;;  %v879_v44 = vmax.f32 %v855_v36, 0.0  ;;  %v792_v30 = vld [vmem:[#allocation2 + $0x18] sm:$0xff]  ;;  %v804_v31 = vld [vmem:[#allocation2 + $0x20] sm:$0xff] }
 0x1cc   : > { %v827_v45 = vmul.f32 %v1883_v13, %v798_v33  ;;  %v828_v46 = vmul.f32 %v1883_v13, %v799_v34  ;;  %v844_v23 = vadd.f32 %v1885_v14, %v815_v40  ;;  %v845_v47 = vadd.f32 %v1885_v14, %v816_v41  ;;  %v793_v43 = vld [vmem:[#allocation2 + $0x98] sm:$0xff] }
 0x1cd   : > { %993 = vmatmul.mubr.bf16.vlgmr.msra.gmra.mxu0 %v888_v37  ;;  %1053 = vmatmul.mubr.bf16.vlgmr.msra.gmra.mxu1 %v894_v38  ;;  %v889_v48 = vpack.c.bf16 %v867_v5, %v866_v39  ;;  %v895_v49 = vpack.c.bf16 %v879_v44, %v878_v42  ;;  %v817_v60 = vmul.f32 %v1883_v13, %v788_v52  ;;  %v948_v52 = vld [vmem:[%s2035_s6] sm:$0x3] }
 0x1ce   : > { %1002 = vmatprep.mubr.bf16.mxu0 %v1647_v63  ;;  %1062 = vmatprep.mubr.bf16.mxu1 %v1647_v63  ;;  %v856_v50 = vadd.f32 %v1885_v14, %v827_v45  ;;  %v857_v51 = vadd.f32 %v1885_v14, %v828_v46  ;;  %v868_v57 = vmax.f32 %v844_v23, 0.0  ;;  %v869_v58 = vmax.f32 %v845_v47, 0.0 }
 0x1cf   : > { %v818_v61 = vmul.f32 %v1883_v13, %v789_v53  ;;  %v829_v4 = vmul.f32 %v1883_v13, %v800_v54  ;;  %v830_v6 = vmul.f32 %v1883_v13, %v801_v56  ;;  %v846_v7 = vadd.f32 %v1885_v14, %v817_v60 }
 0x1d0   : > { %v880_v0 = vmax.f32 %v856_v50, 0.0  ;;  %v881_v1 = vmax.f32 %v857_v51, 0.0  ;;  %v890_v9 = vpack.c.bf16 %v869_v58, %v868_v57  ;;  %v819_v19 = vmul.f32 %v1883_v13, %v790_v59 }
 0x1d1   : > { %v847_v8 = vadd.f32 %v1885_v14, %v818_v61  ;;  %v858_v10 = vadd.f32 %v1885_v14, %v829_v4  ;;  %v859_v12 = vadd.f32 %v1885_v14, %v830_v6  ;;  %v870_v3 = vmax.f32 %v846_v7, 0.0 }
 0x1d2   : > { %v896_v2 = vpack.c.bf16 %v881_v1, %v880_v0  ;;  %v820_v11 = vmul.f32 %v1883_v13, %v791_v15  ;;  %v831_v20 = vmul.f32 %v1883_v13, %v802_v16  ;;  %v832_v24 = vmul.f32 %v1883_v13, %v803_v17 }
 0x1d3   : > { %v871_v18 = vmax.f32 %v847_v8, 0.0  ;;  %v882_v21 = vmax.f32 %v858_v10, 0.0  ;;  %v883_v22 = vmax.f32 %v859_v12, 0.0  ;;  %v848_v25 = vadd.f32 %v1885_v14, %v819_v19 }
 0x1d4   : > { %v849_v27 = vadd.f32 %v1885_v14, %v820_v11  ;;  %v860_v36 = vadd.f32 %v1885_v14, %v831_v20  ;;  %v861_v29 = vadd.f32 %v1885_v14, %v832_v24  ;;  %v821_v34 = vmul.f32 %v1883_v13, %v792_v30 }
 0x1d5   : > { %1003 = vmatmul.mubr.bf16.gmra.mxu0 %v889_v48  ;;  %1063 = vmatmul.mubr.bf16.gmra.mxu1 %v895_v49  ;;  %v891_v26 = vpack.c.bf16 %v871_v18, %v870_v3  ;;  %v897_v28 = vpack.c.bf16 %v883_v22, %v882_v21  ;;  %v872_v55 = vmax.f32 %v848_v25, 0.0  ;;  %v822_v37 = vmul.f32 %v1883_v13, %v793_v43 }
 0x1d6   : > { %1012 = vmatprep.mubr.bf16.mxu0 %v1647_v63  ;;  %1072 = vmatprep.mubr.bf16.mxu1 %v1647_v63  ;;  %v873_v33 = vmax.f32 %v849_v27, 0.0  ;;  %v884_v38 = vmax.f32 %v860_v36, 0.0  ;;  %v885_v39 = vmax.f32 %v861_v29, 0.0  ;;  %v833_v5 = vmul.f32 %v1883_v13, %v804_v31 }
 0x1d7   : > { %v834_v40 = vmul.f32 %v1883_v13, %v805_v32  ;;  %v850_v41 = vadd.f32 %v1885_v14, %v821_v34  ;;  %v851_v42 = vadd.f32 %v1885_v14, %v822_v37  ;;  %v1951_v53 = vrot.slane %v948_v52, %v774_v62 }
 0x1d8   : > { %v892_v44 = vpack.c.bf16 %v873_v33, %v872_v55  ;;  %v898_v45 = vpack.c.bf16 %v885_v39, %v884_v38  ;;  %v862_v46 = vadd.f32 %v1885_v14, %v833_v5 }
 0x1d9   : > { %v863_v23 = vadd.f32 %v1885_v14, %v834_v40  ;;  %v874_v47 = vmax.f32 %v850_v41, 0.0  ;;  %v875_v48 = vmax.f32 %v851_v42, 0.0  ;;  %v956_v14 = vsub.s32 1, %v1870_v35 }
 0x1da   : > { %v886_v49 = vmax.f32 %v862_v46, 0.0 }
 0x1db   : > { %v887_v13 = vmax.f32 %v863_v23, 0.0  ;;  %v893_v50 = vpack.c.bf16 %v875_v48, %v874_v47  ;;  %v1953_v54 = vrot.slane %v948_v52, %v956_v14 }
 0x1dd   : > { %1013 = vmatmul.mubr.bf16.gmra.mxu0 %v890_v9  ;;  %1073 = vmatmul.mubr.bf16.gmra.mxu1 %v896_v2  ;;  %v899_v51 = vpack.c.bf16 %v887_v13, %v886_v49 }
 0x1de   : > { %1022 = vmatprep.mubr.bf16.mxu0 %v1647_v63  ;;  %1082 = vmatprep.mubr.bf16.mxu1 %v1647_v63 }
 0x1e5   : > { %1023 = vmatmul.mubr.bf16.gmra.mxu0 %v891_v26  ;;  %1083 = vmatmul.mubr.bf16.gmra.mxu1 %v897_v28 }
 0x1e6   : > { %1032 = vmatprep.mubr.bf16.mxu0 %v1647_v63  ;;  %1092 = vmatprep.mubr.bf16.mxu1 %v1647_v63 }
 0x1ed   : > { %1033 = vmatmul.mubr.bf16.gmra.mxu0 %v892_v44  ;;  %1093 = vmatmul.mubr.bf16.gmra.mxu1 %v898_v45 }
 0x1ee   : > { %1042 = vmatprep.mubr.bf16.mxu0 %v1647_v63  ;;  %1102 = vmatprep.mubr.bf16.mxu1 %v1647_v63 }
 0x1f5   : > { %1043 = vmatmul.mubr.bf16.gmra.mxu0 %v893_v50  ;;  %1103 = vmatmul.mubr.bf16.gmra.mxu1 %v899_v51 }
 0x28d   : > { %v994_v56 = vpop.f32.mrf.mxu0  ;;  %v1054_v57 = vpop.f32.mrf.mxu1 }
 0x28e   : > { %v995_v63 = vadd.f32 %v994_v56, %v1951_v53  ;;  %v1055_v58 = vadd.f32 %v1054_v57, %v1951_v53 }
 0x28f   : > { %v996_v60 = vpop.f32.mrf.mxu0  ;;  %v1056_v61 = vpop.f32.mrf.mxu1 }
 0x290   : > { %1113 = vst [vmem:[#allocation11] sm:$0xff] %v995_v63  ;;  %1137 = vst [vmem:[#allocation11 + $0xc0] sm:$0xff] %v1055_v58  ;;  %v997_v0 = vadd.f32 %v996_v60, %v1953_v54  ;;  %v1057_v1 = vadd.f32 %v1056_v61, %v1953_v54 }
 0x291   : > { %v998_v4 = vpop.f32.mrf.mxu0  ;;  %v1058_v35 = vpop.f32.mrf.mxu1 }
 0x292   : > { %1114 = vst [vmem:[#allocation11 + $0x8] sm:$0xff] %v997_v0  ;;  %1138 = vst [vmem:[#allocation11 + $0xc8] sm:$0xff] %v1057_v1  ;;  %v999_v62 = vadd.f32 %v998_v4, %v1951_v53  ;;  %v1059_v6 = vadd.f32 %v1058_v35, %v1951_v53 }
 0x293   : > { %v1000_v7 = vpop.f32.mrf.mxu0  ;;  %v1060_v8 = vpop.f32.mrf.mxu1 }
 0x294   : > { %1115 = vst [vmem:[#allocation11 + $0x10] sm:$0xff] %v999_v62  ;;  %1139 = vst [vmem:[#allocation11 + $0xd0] sm:$0xff] %v1059_v6  ;;  %v1001_v9 = vadd.f32 %v1000_v7, %v1953_v54  ;;  %v1061_v2 = vadd.f32 %v1060_v8, %v1953_v54 }
 0x295   : > { %v1004_v10 = vpop.f32.mrf.mxu0  ;;  %v1064_v12 = vpop.f32.mrf.mxu1 }
 0x296   : > { %1116 = vst [vmem:[#allocation11 + $0x18] sm:$0xff] %v1001_v9  ;;  %1140 = vst [vmem:[#allocation11 + $0xd8] sm:$0xff] %v1061_v2  ;;  %v1005_v59 = vadd.f32 %v1004_v10, %v1951_v53  ;;  %v1065_v15 = vadd.f32 %v1064_v12, %v1951_v53 }
 0x297   : > { %v1006_v16 = vpop.f32.mrf.mxu0  ;;  %v1066_v17 = vpop.f32.mrf.mxu1 }
 0x298   : > { %1117 = vst [vmem:[#allocation11 + $0x20] sm:$0xff] %v1005_v59  ;;  %1141 = vst [vmem:[#allocation11 + $0xe0] sm:$0xff] %v1065_v15  ;;  %v1007_v3 = vadd.f32 %v1006_v16, %v1953_v54  ;;  %v1067_v18 = vadd.f32 %v1066_v17, %v1953_v54 }
 0x299   : > { %v1008_v19 = vpop.f32.mrf.mxu0  ;;  %v1068_v11 = vpop.f32.mrf.mxu1 }
 0x29a   : > { %1118 = vst [vmem:[#allocation11 + $0x28] sm:$0xff] %v1007_v3  ;;  %1142 = vst [vmem:[#allocation11 + $0xe8] sm:$0xff] %v1067_v18  ;;  %v1009_v21 = vadd.f32 %v1008_v19, %v1951_v53  ;;  %v1069_v22 = vadd.f32 %v1068_v11, %v1951_v53 }
 0x29b   : > { %v1010_v20 = vpop.f32.mrf.mxu0  ;;  %v1070_v24 = vpop.f32.mrf.mxu1 }
 0x29c   : > { %1119 = vst [vmem:[#allocation11 + $0x30] sm:$0xff] %v1009_v21  ;;  %1143 = vst [vmem:[#allocation11 + $0xf0] sm:$0xff] %v1069_v22  ;;  %v1011_v25 = vadd.f32 %v1010_v20, %v1953_v54  ;;  %v1071_v27 = vadd.f32 %v1070_v24, %v1953_v54 }
 0x29d   : > { %v1014_v26 = vpop.f32.mrf.mxu0  ;;  %v1074_v28 = vpop.f32.mrf.mxu1 }
 0x29e   : > { %1120 = vst [vmem:[#allocation11 + $0x38] sm:$0xff] %v1011_v25  ;;  %1144 = vst [vmem:[#allocation11 + $0xf8] sm:$0xff] %v1071_v27  ;;  %v1015_v36 = vadd.f32 %v1014_v26, %v1951_v53  ;;  %v1075_v29 = vadd.f32 %v1074_v28, %v1951_v53 }
 0x29f   : > { %v1016_v30 = vpop.f32.mrf.mxu0  ;;  %v1076_v43 = vpop.f32.mrf.mxu1 }
 0x2a0   : > { %1121 = vst [vmem:[#allocation11 + $0x40] sm:$0xff] %v1015_v36  ;;  %1145 = vst [vmem:[#allocation11 + $0x100] sm:$0xff] %v1075_v29  ;;  %v1017_v31 = vadd.f32 %v1016_v30, %v1953_v54  ;;  %v1077_v32 = vadd.f32 %v1076_v43, %v1953_v54 }
 0x2a1   : > { %v1018_v55 = vpop.f32.mrf.mxu0  ;;  %v1078_v33 = vpop.f32.mrf.mxu1 }
 0x2a2   : > { %1122 = vst [vmem:[#allocation11 + $0x48] sm:$0xff] %v1017_v31  ;;  %1146 = vst [vmem:[#allocation11 + $0x108] sm:$0xff] %v1077_v32  ;;  %v1019_v34 = vadd.f32 %v1018_v55, %v1951_v53  ;;  %v1079_v37 = vadd.f32 %v1078_v33, %v1951_v53 }
 0x2a3   : > { %v1020_v38 = vpop.f32.mrf.mxu0  ;;  %v1080_v39 = vpop.f32.mrf.mxu1 }
 0x2a4   : > { %1123 = vst [vmem:[#allocation11 + $0x50] sm:$0xff] %v1019_v34  ;;  %1147 = vst [vmem:[#allocation11 + $0x110] sm:$0xff] %v1079_v37  ;;  %v1021_v5 = vadd.f32 %v1020_v38, %v1953_v54  ;;  %v1081_v40 = vadd.f32 %v1080_v39, %v1953_v54 }
 0x2a5   : > { %v1024_v41 = vpop.f32.mrf.mxu0  ;;  %v1084_v42 = vpop.f32.mrf.mxu1 }
 0x2a6   : > { %1124 = vst [vmem:[#allocation11 + $0x58] sm:$0xff] %v1021_v5  ;;  %1148 = vst [vmem:[#allocation11 + $0x118] sm:$0xff] %v1081_v40  ;;  %v1025_v44 = vadd.f32 %v1024_v41, %v1951_v53  ;;  %v1085_v45 = vadd.f32 %v1084_v42, %v1951_v53 }
 0x2a7   : > { %v1026_v46 = vpop.f32.mrf.mxu0  ;;  %v1086_v23 = vpop.f32.mrf.mxu1 }
 0x2a8   : > { %1125 = vst [vmem:[#allocation11 + $0x60] sm:$0xff] %v1025_v44  ;;  %1149 = vst [vmem:[#allocation11 + $0x120] sm:$0xff] %v1085_v45  ;;  %v1027_v47 = vadd.f32 %v1026_v46, %v1953_v54  ;;  %v1087_v48 = vadd.f32 %v1086_v23, %v1953_v54 }
 0x2a9   : > { %v1028_v49 = vpop.f32.mrf.mxu0  ;;  %v1088_v13 = vpop.f32.mrf.mxu1 }
 0x2aa   : > { %1126 = vst [vmem:[#allocation11 + $0x68] sm:$0xff] %v1027_v47  ;;  %1150 = vst [vmem:[#allocation11 + $0x128] sm:$0xff] %v1087_v48  ;;  %v1029_v50 = vadd.f32 %v1028_v49, %v1951_v53  ;;  %v1089_v51 = vadd.f32 %v1088_v13, %v1951_v53 }
 0x2ab   : > { %v1030_v52 = vpop.f32.mrf.mxu0  ;;  %v1090_v14 = vpop.f32.mrf.mxu1 }
 0x2ac   : > { %1127 = vst [vmem:[#allocation11 + $0x70] sm:$0xff] %v1029_v50  ;;  %1151 = vst [vmem:[#allocation11 + $0x130] sm:$0xff] %v1089_v51  ;;  %v1031_v56 = vadd.f32 %v1030_v52, %v1953_v54  ;;  %v1091_v57 = vadd.f32 %v1090_v14, %v1953_v54 }
 0x2ad   : > { %v1034_v63 = vpop.f32.mrf.mxu0  ;;  %v1094_v58 = vpop.f32.mrf.mxu1 }
 0x2ae   : > { %1128 = vst [vmem:[#allocation11 + $0x78] sm:$0xff] %v1031_v56  ;;  %1152 = vst [vmem:[#allocation11 + $0x138] sm:$0xff] %v1091_v57  ;;  %v1035_v60 = vadd.f32 %v1034_v63, %v1951_v53  ;;  %v1095_v61 = vadd.f32 %v1094_v58, %v1951_v53 }
 0x2af   : > { %v1036_v0 = vpop.f32.mrf.mxu0  ;;  %v1096_v1 = vpop.f32.mrf.mxu1 }
 0x2b0   : > { %1129 = vst [vmem:[#allocation11 + $0x80] sm:$0xff] %v1035_v60  ;;  %1153 = vst [vmem:[#allocation11 + $0x140] sm:$0xff] %v1095_v61  ;;  %v1037_v4 = vadd.f32 %v1036_v0, %v1953_v54  ;;  %v1097_v35 = vadd.f32 %v1096_v1, %v1953_v54 }
 0x2b1   : > { %v1038_v62 = vpop.f32.mrf.mxu0  ;;  %v1098_v6 = vpop.f32.mrf.mxu1 }
 0x2b2   : > { %1130 = vst [vmem:[#allocation11 + $0x88] sm:$0xff] %v1037_v4  ;;  %1154 = vst [vmem:[#allocation11 + $0x148] sm:$0xff] %v1097_v35  ;;  %v1039_v7 = vadd.f32 %v1038_v62, %v1951_v53  ;;  %v1099_v8 = vadd.f32 %v1098_v6, %v1951_v53 }
 0x2b3   : > { %v1040_v9 = vpop.f32.mrf.mxu0  ;;  %v1100_v2 = vpop.f32.mrf.mxu1 }
 0x2b4   : > { %1131 = vst [vmem:[#allocation11 + $0x90] sm:$0xff] %v1039_v7  ;;  %1155 = vst [vmem:[#allocation11 + $0x150] sm:$0xff] %v1099_v8  ;;  %v1041_v10 = vadd.f32 %v1040_v9, %v1953_v54  ;;  %v1101_v12 = vadd.f32 %v1100_v2, %v1953_v54 }
 0x2b5   : > { %v1044_v59 = vpop.f32.mrf.mxu0  ;;  %v1104_v15 = vpop.f32.mrf.mxu1 }
 0x2b6   : > { %1132 = vst [vmem:[#allocation11 + $0x98] sm:$0xff] %v1041_v10  ;;  %1156 = vst [vmem:[#allocation11 + $0x158] sm:$0xff] %v1101_v12  ;;  %v1045_v16 = vadd.f32 %v1044_v59, %v1951_v53  ;;  %v1105_v17 = vadd.f32 %v1104_v15, %v1951_v53 }
 0x2b7   : > { %v1046_v3 = vpop.f32.mrf.mxu0  ;;  %v1106_v18 = vpop.f32.mrf.mxu1 }
 0x2b8   : > { %1133 = vst [vmem:[#allocation11 + $0xa0] sm:$0xff] %v1045_v16  ;;  %1157 = vst [vmem:[#allocation11 + $0x160] sm:$0xff] %v1105_v17  ;;  %v1047_v19 = vadd.f32 %v1046_v3, %v1953_v54  ;;  %v1107_v11 = vadd.f32 %v1106_v18, %v1953_v54 }
 0x2b9   : > { %v1048_v21 = vpop.f32.mrf.mxu0  ;;  %v1108_v22 = vpop.f32.mrf.mxu1 }
 0x2ba   : > { %1134 = vst [vmem:[#allocation11 + $0xa8] sm:$0xff] %v1047_v19  ;;  %1158 = vst [vmem:[#allocation11 + $0x168] sm:$0xff] %v1107_v11  ;;  %v1049_v20 = vadd.f32 %v1048_v21, %v1951_v53  ;;  %v1109_v24 = vadd.f32 %v1108_v22, %v1951_v53 }
 0x2bb   : > { %v1050_v25 = vpop.f32.mrf.mxu0  ;;  %v1110_v27 = vpop.f32.mrf.mxu1 }
 0x2bc   : > { %1135 = vst [vmem:[#allocation11 + $0xb0] sm:$0xff] %v1049_v20  ;;  %1159 = vst [vmem:[#allocation11 + $0x170] sm:$0xff] %v1109_v24  ;;  %v1051_v26 = vadd.f32 %v1050_v25, %v1953_v54  ;;  %v1111_v28 = vadd.f32 %v1110_v27, %v1953_v54 }
 0x2be   : > { %1136 = vst [vmem:[#allocation11 + $0xb8] sm:$0xff] %v1051_v26  ;;  %1160 = vst [vmem:[#allocation11 + $0x178] sm:$0xff] %v1111_v28 }
 0x2bf PF: > { %p2005_p4 = scmp.eq.s32.totalorder %s1281_s27, 1  ;;  %s1649_s21 = smov [#allocation11]  }
 0x2c0   : > { %s1177_s22 = sshll.u32 %s1649_s21, 4  ;;  %s1178_s22 = int_to_ptr.vmem [resolvable:$true] %s1177_s22 }
 0x2c1   : > { %s1579_s23 = scalar_lea.vmem %s1178_s22, 6144  ;;  %s1585_s9 = scalar_lea.vmem %s1178_s22, 12288 }
 0x2c2   : > { %p1580_p7 = scmp.ne.s32.totalorder %s1178_s22, %s1579_s23  ;;  %p1586_p8 = scmp.lt.s32.totalorder %s1178_s22, %s1178_s22 }
 0x2c3   : > { %p1587_p2 = scmp.lt.s32.totalorder %s1585_s9, %s1579_s23 }
 0x2c4   : > { %p1581_p0 = pnand %p1580_p7, %p2005_p4 }
 0x2c5   : > { %p1588_p5 = por %p1587_p2, %p1586_p8 }
 0x2c6   : > { %p1582_p1 = pneg %p1581_p0 }
 0x2c8   : > { %p1589_p9 = pnand %p1588_p5, %p1582_p1 }
 0x2ca   : > { %1592 = shalt.err (!%p1589_p9)
}
 0x2cb   : > { %s1650_s10 = smov 256   ;;  %s1651_s27 = smov 16  }
 0x2cc   : > { %1434 = dma.vmem_to_hbm [thread:$0]  (%p2005_p4), %s1178_s22, 6144, %s2036_s7, [#allocation7], %s1650_s10, %s1650_s10, %s1651_s27  }
 0x2cd PF: > { %p1461_p10 = scmp.eq.s32.totalorder %s1282_s28, 1  ;;  %p2041_p12 = scmp.ge.s32.totalorder %s1637_s26, 2 }
 0x2cf   : > { %p1449_p11 = pnand %p1461_p10, %p2041_p12 }
 0x2d1   : > { %p1450_p13 = pneg %p1449_p11 }
 0x2d3   : > { %1624 = dma.done.wait (%p1450_p13), [#allocation7], 6144  }
 0x2d4   : > { %1626 = vsyncadd (%p1450_p13), [#allocation7], 4294961152  ;;  %s24_s26 = sadd.s32 1, %s1637_s26   ;;  %s2042_s24 = smov %s1633_s25 }
 0x2d5   : > { %p21_p6 = scmp.ge.s32.totalorder %s24_s26, 4   ;;  %s2043_s25 = smov %s2045_s29 }
 0x2d7   :  { %23 = sbr.rel (!%p21_p6) target bundleno = 6 (0x6), region = 119 }
 0x2dc   :  { %1198 = vsyncpa [#allocation6], 1 }
 0x2dd   :  { %1200 = vsyncpa [#allocation6 + $0x1], 1 }
 0x2de   :  { %1201 = vsyncpa [#allocation9], 1 }
 0x2df   :  { %1202 = vsyncpa [#allocation7], 1 }
 0x2e0   :  { %1204 = vsyncpa [#allocation7 + $0x1], 1 }

</bundles_post_ra>
